<compile_context>
chip_gen: v7x
topology: tpu7x:2x2x1
jax: 0.10.0
libtpu: 0.0.40
codegen_flags: <defaults>
</compile_context>

<pallas_src>
import jax
import jax.numpy as jnp
from jax.experimental import pallas as pl
from jax.experimental.pallas import tpu as pltpu

# ----------------------------- model dims -----------------------------------
C_IN = 2          # conv1 in_channels
C1, C2, C3 = 32, 128, 256
HIDDEN = 128      # LSTM hidden size
FC_OUT = 1
H4 = 4 * HIDDEN
MAX_CHUNK = 32    # timesteps per grid step (amortizes ~600-cycle grid overhead)
_HI = jax.lax.Precision.HIGHEST


def _permute_gate_cols(w):
    """Reorder gate columns (i, f, g, o) -> (i, f, o, g).

    Lets the kernel apply a single sigmoid over the contiguous lane range
    [0:3H] and a single tanh over [3H:4H]. Zero runtime cost (fold time)."""
    return jnp.concatenate(
        [w[..., :2 * HIDDEN], w[..., 3 * HIDDEN:], w[..., 2 * HIDDEN:3 * HIDDEN]],
        axis=-1)


# ---------------------- fused gate-precompute + LSTM kernel ------------------
def _lstm_fused(x_flat, w_ih_eff, b_gates, w_hh, batch, seq_len, t_chunk):
    """x_flat: (n_chunks*t_chunk*batch, C_IN), time-major rows (zero-padded).

    Returns the last two hidden states, shape (2, batch, HIDDEN)."""
    n_chunks = pl.cdiv(seq_len, t_chunk)
    rem = seq_len - (n_chunks - 1) * t_chunk        # valid steps in last chunk
    last_chunk = n_chunks - 1
    rows = t_chunk * batch
    padded_rows = n_chunks * rows
    assert x_flat.shape == (padded_rows, C_IN)

    # Trace-time (chunk, step) positions of the final two timesteps.
    write1 = (last_chunk, rem - 1)                  # t = T-1
    if rem >= 2:
        write0 = (last_chunk, rem - 2)              # t = T-2
    elif n_chunks >= 2:
        write0 = (last_chunk - 1, t_chunk - 1)
    else:
        write0 = None  # T == 1: slot 0 stays zero (module semantics need T >= 2)

    def kernel(x_ref, wih_ref, bg_ref, whh_ref, ho_ref, g_scr, h_scr, c_scr):
        chunk = pl.program_id(0)

        @pl.when(chunk == 0)
        def _():
            h_scr[...] = jnp.zeros_like(h_scr)
            c_scr[...] = jnp.zeros_like(c_scr)
            ho_ref[...] = jnp.zeros_like(ho_ref)

        # --- Time-parallel input projection for the whole chunk (off the serial
        #     path).  x is flattened time-major -> sublane-dense VPU FMAs.
        #     K == C_IN == 2 -> two broadcast-FMAs, no degenerate MXU matmul.
        if n_chunks == 1:
            xc = x_ref[...]                                   # (rows, 2)
        else:
            # rows == MAX_CHUNK * batch here, always a multiple of 8.
            start = pl.multiple_of(chunk * rows, 8)
            xc = x_ref[pl.ds(start, rows), :]                 # (rows, 2)
        w = wih_ref[...]                                      # (2, 4H) folded
        b = bg_ref[...]                                       # (1, 4H) folded
        g_scr[...] = xc[:, 0:1] * w[0:1, :] + xc[:, 1:2] * w[1:2, :] + b

        whh = whh_ref[...]                                    # (H, 4H) resident
        # TODO(synk): verify in the bundle dump that whh is not re-pushed to the
        # MXU weight registers every unrolled step; if it is, use
        # pltpu.matmul_push_rhs / matmul_acc_lhs / matmul_pop explicitly.

        def write_out(slot, value, chunk_idx):
            if n_chunks == 1:
                ho_ref[slot] = value
            else:
                @pl.when(chunk == chunk_idx)
                def _():
                    ho_ref[slot] = value

        # (h, c) live in vregs across the unrolled chunk; VMEM scratch is only
        # touched once per chunk boundary.
        h = h_scr[...]                                        # (B, H)
        c = c_scr[...]

        for s in range(t_chunk):                              # fully unrolled
            gates = g_scr[pl.ds(s * batch, batch), :] + jnp.dot(
                h, whh, preferred_element_type=jnp.float32)   # (B, 4H)
            # gate columns were permuted at fold time to (i, f, o, g):
            ifo = jax.nn.sigmoid(gates[:, :3 * HIDDEN])
            g_g = jnp.tanh(gates[:, 3 * HIDDEN:])
            i_g = ifo[:, 0 * HIDDEN:1 * HIDDEN]
            f_g = ifo[:, 1 * HIDDEN:2 * HIDDEN]
            o_g = ifo[:, 2 * HIDDEN:3 * HIDDEN]
            c_new = f_g * c + i_g * g_g
            h_new = o_g * jnp.tanh(c_new)
            if s >= rem:
                # Padded tail step: only real in chunks before the last one.
                valid = chunk != last_chunk
                h_new = jnp.where(valid, h_new, h)
                c_new = jnp.where(valid, c_new, c)
            h, c = h_new, c_new

            # Write only the final two hidden states (no rolling per-step copy).
            if write0 is not None and s == write0[1]:
                write_out(0, h, write0[0])
            if s == write1[1]:
                write_out(1, h, write1[0])

        h_scr[...] = h
        c_scr[...] = c

    grid_spec = pltpu.PrefetchScalarGridSpec(
        num_scalar_prefetch=0,
        grid=(n_chunks,),
        in_specs=[
            # x is tiny; full-extent constant-index block -> one DMA, resident.
            pl.BlockSpec((padded_rows, C_IN), lambda t: (0, 0)),
            pl.BlockSpec((C_IN, H4), lambda t: (0, 0)),       # folded conv+W_ih
            pl.BlockSpec((1, H4), lambda t: (0, 0)),          # folded bias
            pl.BlockSpec((HIDDEN, H4), lambda t: (0, 0)),     # W_hh
        ],
        # Same block index every step -> output stays resident in VMEM and is
        # written back to HBM once at the end of the grid.
        out_specs=pl.BlockSpec((2, batch, HIDDEN), lambda t: (0, 0, 0)),
        scratch_shapes=[
            pltpu.VMEM((rows, H4), jnp.float32),       # chunk gate pre-activations
            pltpu.VMEM((batch, HIDDEN), jnp.float32),  # h carry across chunks
            pltpu.VMEM((batch, HIDDEN), jnp.float32),  # c carry across chunks
        ],
    )
    return pl.pallas_call(
        kernel,
        out_shape=jax.ShapeDtypeStruct((2, batch, HIDDEN), jnp.float32),
        grid_spec=grid_spec,
        compiler_params=pltpu.CompilerParams(
            dimension_semantics=("arbitrary",)),   # time chunks carry (h, c)
    )(x_flat, w_ih_eff, b_gates, w_hh)


# ----------------------------- full forward ----------------------------------
def cnn_lstm_forward(x, params):
    """x: (B, T, C_IN) float32 -> (B, 2, 1), matching CnnLstm.forward (T >= 2)."""
    B, T, _ = x.shape

    # One-time algebraic fold (exact: the conv chain has no activations), done
    # at f32 HIGHEST precision so every timestep's gates match the PyTorch f32
    # conv chain:  gates_x = x @ W_ih_eff + b_gates.
    w_eff = jnp.dot(jnp.dot(params["w1"], params["w2"], precision=_HI),
                    params["w3"], precision=_HI)                          # (2, C3)
    b_eff = jnp.dot(jnp.dot(params["b1"], params["w2"], precision=_HI)
                    + params["b2"], params["w3"], precision=_HI) + params["b3"]
    w_ih_eff = jnp.dot(w_eff, params["w_ih"], precision=_HI)              # (2, 4H)
    b_gates = jnp.dot(b_eff, params["w_ih"], precision=_HI) + params["b_lstm"]

    # Gate-column permute (i,f,g,o) -> (i,f,o,g); also permute W_hh columns.
    w_ih_eff = _permute_gate_cols(w_ih_eff)
    b_gates = _permute_gate_cols(b_gates)
    w_hh = _permute_gate_cols(params["w_hh"])

    # Only the tiny (B, T, 2) input gets transposed to time-major & flattened.
    x_flat = jnp.transpose(x, (1, 0, 2)).reshape(T * B, C_IN)             # (T*B, 2)

    t_chunk = min(T, MAX_CHUNK)
    n_chunks = pl.cdiv(T, t_chunk)
    pad_rows = n_chunks * t_chunk * B - T * B
    if pad_rows:
        # Padded timesteps are masked inside the kernel (state must not evolve).
        x_flat = jnp.pad(x_flat, ((0, pad_rows), (0, 0)))

    h_last2 = _lstm_fused(x_flat, w_ih_eff, b_gates, w_hh, B, T, t_chunk)  # (2, B, H)

    # Final Linear(128 -> 1) only on the last two timesteps (tiny; plain JAX).
    y = jnp.einsum("tbh,ho->tbo", h_last2, params["w_fc"]) + params["b_fc"]  # (2, B, 1)
    return jnp.transpose(y, (1, 0, 2))                                       # (B, 2, 1)


# -------------------------- plain-JAX reference -------------------------------
def reference_forward(x, params):
    B, T, _ = x.shape
    h = x.reshape(B * T, C_IN)
    h = jnp.dot(h, params["w1"], precision=_HI) + params["b1"]
    h = jnp.dot(h, params["w2"], precision=_HI) + params["b2"]
    h = jnp.dot(h, params["w3"], precision=_HI) + params["b3"]
    feat = h.reshape(B, T, C3)

    def step(carry, x_t):
        h_prev, c_prev = carry
        gates = (jnp.dot(x_t, params["w_ih"], precision=_HI)
                 + jnp.dot(h_prev, params["w_hh"], precision=_HI)
                 + params["b_lstm"])
        i_g = jax.nn.sigmoid(gates[:, 0 * HIDDEN:1 * HIDDEN])
        f_g = jax.nn.sigmoid(gates[:, 1 * HIDDEN:2 * HIDDEN])
        g_g = jnp.tanh(gates[:, 2 * HIDDEN:3 * HIDDEN])
        o_g = jax.nn.sigmoid(gates[:, 3 * HIDDEN:4 * HIDDEN])
        c_new = f_g * c_prev + i_g * g_g
        h_new = o_g * jnp.tanh(c_new)
        return (h_new, c_new), h_new

    h0 = jnp.zeros((B, HIDDEN), jnp.float32)
    c0 = jnp.zeros((B, HIDDEN), jnp.float32)
    _, hs = jax.lax.scan(step, (h0, c0), jnp.transpose(feat, (1, 0, 2)))
    hs = jnp.transpose(hs, (1, 0, 2))                      # (B, T, H)
    y = hs @ params["w_fc"] + params["b_fc"]               # (B, T, 1)
    return y[:, -2:]


# ------------------------- deterministic params ------------------------------
def init_params(key):
    ks = jax.random.split(key, 10)

    def u(k, shape, fan_in):
        bound = 1.0 / jnp.sqrt(jnp.float32(fan_in))
        return jax.random.uniform(k, shape, jnp.float32, -bound, bound)

    params = {
        # conv weights stored as (in, out)  (== torch weight[:, :, 0].T)
        "w1": u(ks[0], (C_IN, C1), C_IN), "b1": u(ks[1], (1, C1), C_IN),
        "w2": u(ks[2], (C1, C2), C1),     "b2": u(ks[3], (1, C2), C1),
        "w3": u(ks[4], (C2, C3), C2),     "b3": u(ks[5], (1, C3), C2),
        # LSTM weights stored transposed: (input, 4H) and (H, 4H)
        "w_ih": u(ks[6], (C3, H4), HIDDEN),
        "w_hh": u(ks[7], (HIDDEN, H4), HIDDEN),
        # b_ih + b_hh combined (matches torch's sum in distribution)
        "b_lstm": u(ks[8], (1, H4), HIDDEN) + u(ks[9], (1, H4), HIDDEN),
        # fc stored as (HIDDEN, 1)
        "w_fc": u(jax.random.fold_in(key, 100), (HIDDEN, FC_OUT), HIDDEN),
        "b_fc": u(jax.random.fold_in(key, 101), (1, FC_OUT), HIDDEN),
    }
    return params


if __name__ == "__main__":
    key = jax.random.PRNGKey(0)
    params = init_params(key)
    fwd = jax.jit(cnn_lstm_forward)
    ref = jax.jit(reference_forward)

    # Small shape consistent with the module: batch=2, seq=8, in_channels=2.
    B, T = 2, 8
    x = jax.random.normal(jax.random.fold_in(key, 7), (B, T, C_IN), jnp.float32)
    y = jax.block_until_ready(fwd(x, params))
    assert y.shape == (B, 2, 1), y.shape
    y_ref = jax.block_until_ready(ref(x, params))
    err = float(jnp.max(jnp.abs(y - y_ref)))
    assert jnp.allclose(y, y_ref, atol=1e-4, rtol=1e-4), err

    # Second check: T > MAX_CHUNK and not a multiple of it (multi-chunk carry
    # plus masked padded-tail steps).
    B2, T2 = 2, 37
    x2 = jax.random.normal(jax.random.fold_in(key, 11), (B2, T2, C_IN), jnp.float32)
    y2 = jax.block_until_ready(fwd(x2, params))
    y2_ref = jax.block_until_ready(ref(x2, params))
    err2 = float(jnp.max(jnp.abs(y2 - y2_ref)))
    assert jnp.allclose(y2, y2_ref, atol=1e-3, rtol=1e-3), err2

    print("KERNEL_OK")
</pallas_src>

<mosaic_0001>
module attributes {stable_mosaic.version = 11 : i64} {
  func.func @kernel(%arg0: i32, %arg1: memref<16x2xf32, #tpu.memory_space<vmem>>, %arg2: memref<2x512xf32, #tpu.memory_space<vmem>>, %arg3: memref<1x512xf32, #tpu.memory_space<vmem>>, %arg4: memref<128x512xf32, #tpu.memory_space<vmem>>, %arg5: memref<2x2x128xf32, #tpu.memory_space<vmem>>, %arg6: memref<16x512xf32, #tpu.memory_space<vmem>>, %arg7: memref<2x128xf32, #tpu.memory_space<vmem>>, %arg8: memref<2x128xf32, #tpu.memory_space<vmem>>) attributes {dimension_semantics = [#tpu.dimension_semantics<arbitrary>], iteration_bounds = array<i64: 1>, scalar_prefetch = 0 : i64, scratch_operands = 3 : i64, tpu.core_type = #tpu.core_type<tc>, window_params = [{pipeline_mode = #tpu.pipeline_mode<synchronous>, transform_indices = @transform_0, window_bounds = array<i64: 16, 2>}, {pipeline_mode = #tpu.pipeline_mode<synchronous>, transform_indices = @transform_1, window_bounds = array<i64: 2, 512>}, {pipeline_mode = #tpu.pipeline_mode<synchronous>, transform_indices = @transform_2, window_bounds = array<i64: 1, 512>}, {pipeline_mode = #tpu.pipeline_mode<synchronous>, transform_indices = @transform_3, window_bounds = array<i64: 128, 512>}, {pipeline_mode = #tpu.pipeline_mode<synchronous>, transform_indices = @transform_4, window_bounds = array<i64: 2, 2, 128>}]} {
    %c0_i32 = arith.constant 0 : i32
    %0 = arith.cmpi eq, %arg0, %c0_i32 : i32
    %1 = arith.extui %0 : i1 to i32
    %c0_i32_0 = arith.constant 0 : i32
    %2 = arith.cmpi ne, %1, %c0_i32_0 : i32
    scf.if %2 {
      %cst_47 = arith.constant 0.000000e+00 : f32
      %183 = vector.broadcast %cst_47 : f32 to vector<2x128xf32>
      %c0_48 = arith.constant 0 : index
      %c0_49 = arith.constant 0 : index
      %184 = vector.load %arg7[%c0_48, %c0_49] : memref<2x128xf32, #tpu.memory_space<vmem>>, vector<2x128xf32>
      tpu.vector_store %arg7[%c0_48, %c0_49], %183 {strides = array<i32>} : memref<2x128xf32, #tpu.memory_space<vmem>>, vector<2x128xf32>,
      %cst_50 = arith.constant 0.000000e+00 : f32
      %185 = vector.broadcast %cst_50 : f32 to vector<2x128xf32>
      %c0_51 = arith.constant 0 : index
      %c0_52 = arith.constant 0 : index
      %186 = vector.load %arg8[%c0_51, %c0_52] : memref<2x128xf32, #tpu.memory_space<vmem>>, vector<2x128xf32>
      tpu.vector_store %arg8[%c0_51, %c0_52], %185 {strides = array<i32>} : memref<2x128xf32, #tpu.memory_space<vmem>>, vector<2x128xf32>,
      %cst_53 = arith.constant 0.000000e+00 : f32
      %187 = vector.broadcast %cst_53 : f32 to vector<2x2x128xf32>
      %c0_54 = arith.constant 0 : index
      %c0_55 = arith.constant 0 : index
      %c0_56 = arith.constant 0 : index
      %188 = vector.load %arg5[%c0_54, %c0_55, %c0_56] : memref<2x2x128xf32, #tpu.memory_space<vmem>>, vector<2x2x128xf32>
      tpu.vector_store %arg5[%c0_54, %c0_55, %c0_56], %187 {strides = array<i32>} : memref<2x2x128xf32, #tpu.memory_space<vmem>>, vector<2x2x128xf32>,
    } else {
    }
    %c0 = arith.constant 0 : index
    %c0_1 = arith.constant 0 : index
    %3 = vector.load %arg1[%c0, %c0_1] : memref<16x2xf32, #tpu.memory_space<vmem>>, vector<16x2xf32>
    %c0_2 = arith.constant 0 : index
    %c0_3 = arith.constant 0 : index
    %4 = vector.load %arg2[%c0_2, %c0_3] : memref<2x512xf32, #tpu.memory_space<vmem>>, vector<2x512xf32>
    %c0_4 = arith.constant 0 : index
    %c0_5 = arith.constant 0 : index
    %5 = vector.load %arg3[%c0_4, %c0_5] : memref<1x512xf32, #tpu.memory_space<vmem>>, vector<1x512xf32>
    %6 = vector.extract_strided_slice %3 {offsets = [0, 0], sizes = [16, 1], strides = [1, 1]} : vector<16x2xf32> to vector<16x1xf32>
    %7 = vector.extract_strided_slice %4 {offsets = [0, 0], sizes = [1, 512], strides = [1, 1]} : vector<2x512xf32> to vector<1x512xf32>
    %8 = vector.broadcast %6 : vector<16x1xf32> to vector<16x512xf32>
    %9 = vector.broadcast %7 : vector<1x512xf32> to vector<16x512xf32>
    %10 = arith.mulf %8, %9 : vector<16x512xf32>
    %11 = vector.extract_strided_slice %3 {offsets = [0, 1], sizes = [16, 1], strides = [1, 1]} : vector<16x2xf32> to vector<16x1xf32>
    %12 = vector.extract_strided_slice %4 {offsets = [1, 0], sizes = [1, 512], strides = [1, 1]} : vector<2x512xf32> to vector<1x512xf32>
    %13 = vector.broadcast %11 : vector<16x1xf32> to vector<16x512xf32>
    %14 = vector.broadcast %12 : vector<1x512xf32> to vector<16x512xf32>
    %15 = arith.mulf %13, %14 : vector<16x512xf32>
    %16 = arith.addf %10, %15 : vector<16x512xf32>
    %17 = vector.broadcast %5 : vector<1x512xf32> to vector<16x512xf32>
    %18 = arith.addf %16, %17 : vector<16x512xf32>
    %c0_6 = arith.constant 0 : index
    %c0_7 = arith.constant 0 : index
    %19 = vector.load %arg6[%c0_6, %c0_7] : memref<16x512xf32, #tpu.memory_space<vmem>>, vector<16x512xf32>
    tpu.vector_store %arg6[%c0_6, %c0_7], %18 {strides = array<i32>} : memref<16x512xf32, #tpu.memory_space<vmem>>, vector<16x512xf32>,
    %c0_8 = arith.constant 0 : index
    %c0_9 = arith.constant 0 : index
    %20 = vector.load %arg4[%c0_8, %c0_9] : memref<128x512xf32, #tpu.memory_space<vmem>>, vector<128x512xf32>
    %c0_10 = arith.constant 0 : index
    %c0_11 = arith.constant 0 : index
    %21 = vector.load %arg7[%c0_10, %c0_11] : memref<2x128xf32, #tpu.memory_space<vmem>>, vector<2x128xf32>
    %c0_12 = arith.constant 0 : index
    %c0_13 = arith.constant 0 : index
    %22 = vector.load %arg8[%c0_12, %c0_13] : memref<2x128xf32, #tpu.memory_space<vmem>>, vector<2x128xf32>
    %c0_14 = arith.constant 0 : index
    %c0_15 = arith.constant 0 : index
    %23 = vector.load %arg6[%c0_14, %c0_15] : memref<16x512xf32, #tpu.memory_space<vmem>>, vector<2x512xf32>
    %cst = arith.constant dense<0.000000e+00> : vector<2x512xf32>
    %24 = tpu.matmul %21, %20, %cst {dimension_numbers = #tpu.dot_dimension_numbers<[1], [0], [0], [1], [0, 0, 1, 1], [], []>} : vector<2x128xf32>, vector<128x512xf32>, vector<2x512xf32> -> vector<2x512xf32>
    %25 = arith.addf %23, %24 : vector<2x512xf32>
    %26 = vector.extract_strided_slice %25 {offsets = [0, 0], sizes = [2, 384], strides = [1, 1]} : vector<2x512xf32> to vector<2x384xf32>
    %27 = arith.negf %26 : vector<2x384xf32>
    %28 = math.exp %27 : vector<2x384xf32>
    %cst_16 = arith.constant 1.000000e+00 : f32
    %29 = vector.broadcast %cst_16 : f32 to vector<2x384xf32>
    %30 = arith.addf %29, %28 : vector<2x384xf32>
    %31 = arith.divf %29, %30 : vector<2x384xf32>
    %32 = vector.extract_strided_slice %25 {offsets = [0, 384], sizes = [2, 128], strides = [1, 1]} : vector<2x512xf32> to vector<2x128xf32>
    %33 = math.tanh %32 : vector<2x128xf32>
    %34 = vector.extract_strided_slice %31 {offsets = [0, 0], sizes = [2, 128], strides = [1, 1]} : vector<2x384xf32> to vector<2x128xf32>
    %35 = vector.extract_strided_slice %31 {offsets = [0, 128], sizes = [2, 128], strides = [1, 1]} : vector<2x384xf32> to vector<2x128xf32>
    %36 = vector.extract_strided_slice %31 {offsets = [0, 256], sizes = [2, 128], strides = [1, 1]} : vector<2x384xf32> to vector<2x128xf32>
    %37 = arith.mulf %35, %22 : vector<2x128xf32>
    %38 = arith.mulf %34, %33 : vector<2x128xf32>
    %39 = arith.addf %37, %38 : vector<2x128xf32>
    %40 = math.tanh %39 : vector<2x128xf32>
    %41 = arith.mulf %36, %40 : vector<2x128xf32>
    %c2 = arith.constant 2 : index
    %c0_17 = arith.constant 0 : index
    %42 = vector.load %arg6[%c2, %c0_17] : memref<16x512xf32, #tpu.memory_space<vmem>>, vector<2x512xf32>
    %cst_18 = arith.constant dense<0.000000e+00> : vector<2x512xf32>
    %43 = tpu.matmul %41, %20, %cst_18 {dimension_numbers = #tpu.dot_dimension_numbers<[1], [0], [0], [1], [0, 0, 1, 1], [], []>} : vector<2x128xf32>, vector<128x512xf32>, vector<2x512xf32> -> vector<2x512xf32>
    %44 = arith.addf %42, %43 : vector<2x512xf32>
    %45 = vector.extract_strided_slice %44 {offsets = [0, 0], sizes = [2, 384], strides = [1, 1]} : vector<2x512xf32> to vector<2x384xf32>
    %46 = arith.negf %45 : vector<2x384xf32>
    %47 = math.exp %46 : vector<2x384xf32>
    %cst_19 = arith.constant 1.000000e+00 : f32
    %48 = vector.broadcast %cst_19 : f32 to vector<2x384xf32>
    %49 = arith.addf %48, %47 : vector<2x384xf32>
    %50 = arith.divf %48, %49 : vector<2x384xf32>
    %51 = vector.extract_strided_slice %44 {offsets = [0, 384], sizes = [2, 128], strides = [1, 1]} : vector<2x512xf32> to vector<2x128xf32>
    %52 = math.tanh %51 : vector<2x128xf32>
    %53 = vector.extract_strided_slice %50 {offsets = [0, 0], sizes = [2, 128], strides = [1, 1]} : vector<2x384xf32> to vector<2x128xf32>
    %54 = vector.extract_strided_slice %50 {offsets = [0, 128], sizes = [2, 128], strides = [1, 1]} : vector<2x384xf32> to vector<2x128xf32>
    %55 = vector.extract_strided_slice %50 {offsets = [0, 256], sizes = [2, 128], strides = [1, 1]} : vector<2x384xf32> to vector<2x128xf32>
    %56 = arith.mulf %54, %39 : vector<2x128xf32>
    %57 = arith.mulf %53, %52 : vector<2x128xf32>
    %58 = arith.addf %56, %57 : vector<2x128xf32>
    %59 = math.tanh %58 : vector<2x128xf32>
    %60 = arith.mulf %55, %59 : vector<2x128xf32>
    %c4 = arith.constant 4 : index
    %c0_20 = arith.constant 0 : index
    %61 = vector.load %arg6[%c4, %c0_20] : memref<16x512xf32, #tpu.memory_space<vmem>>, vector<2x512xf32>
    %cst_21 = arith.constant dense<0.000000e+00> : vector<2x512xf32>
    %62 = tpu.matmul %60, %20, %cst_21 {dimension_numbers = #tpu.dot_dimension_numbers<[1], [0], [0], [1], [0, 0, 1, 1], [], []>} : vector<2x128xf32>, vector<128x512xf32>, vector<2x512xf32> -> vector<2x512xf32>
    %63 = arith.addf %61, %62 : vector<2x512xf32>
    %64 = vector.extract_strided_slice %63 {offsets = [0, 0], sizes = [2, 384], strides = [1, 1]} : vector<2x512xf32> to vector<2x384xf32>
    %65 = arith.negf %64 : vector<2x384xf32>
    %66 = math.exp %65 : vector<2x384xf32>
    %cst_22 = arith.constant 1.000000e+00 : f32
    %67 = vector.broadcast %cst_22 : f32 to vector<2x384xf32>
    %68 = arith.addf %67, %66 : vector<2x384xf32>
    %69 = arith.divf %67, %68 : vector<2x384xf32>
    %70 = vector.extract_strided_slice %63 {offsets = [0, 384], sizes = [2, 128], strides = [1, 1]} : vector<2x512xf32> to vector<2x128xf32>
    %71 = math.tanh %70 : vector<2x128xf32>
    %72 = vector.extract_strided_slice %69 {offsets = [0, 0], sizes = [2, 128], strides = [1, 1]} : vector<2x384xf32> to vector<2x128xf32>
    %73 = vector.extract_strided_slice %69 {offsets = [0, 128], sizes = [2, 128], strides = [1, 1]} : vector<2x384xf32> to vector<2x128xf32>
    %74 = vector.extract_strided_slice %69 {offsets = [0, 256], sizes = [2, 128], strides = [1, 1]} : vector<2x384xf32> to vector<2x128xf32>
    %75 = arith.mulf %73, %58 : vector<2x128xf32>
    %76 = arith.mulf %72, %71 : vector<2x128xf32>
    %77 = arith.addf %75, %76 : vector<2x128xf32>
    %78 = math.tanh %77 : vector<2x128xf32>
    %79 = arith.mulf %74, %78 : vector<2x128xf32>
    %c6 = arith.constant 6 : index
    %c0_23 = arith.constant 0 : index
    %80 = vector.load %arg6[%c6, %c0_23] : memref<16x512xf32, #tpu.memory_space<vmem>>, vector<2x512xf32>
    %cst_24 = arith.constant dense<0.000000e+00> : vector<2x512xf32>
    %81 = tpu.matmul %79, %20, %cst_24 {dimension_numbers = #tpu.dot_dimension_numbers<[1], [0], [0], [1], [0, 0, 1, 1], [], []>} : vector<2x128xf32>, vector<128x512xf32>, vector<2x512xf32> -> vector<2x512xf32>
    %82 = arith.addf %80, %81 : vector<2x512xf32>
    %83 = vector.extract_strided_slice %82 {offsets = [0, 0], sizes = [2, 384], strides = [1, 1]} : vector<2x512xf32> to vector<2x384xf32>
    %84 = arith.negf %83 : vector<2x384xf32>
    %85 = math.exp %84 : vector<2x384xf32>
    %cst_25 = arith.constant 1.000000e+00 : f32
    %86 = vector.broadcast %cst_25 : f32 to vector<2x384xf32>
    %87 = arith.addf %86, %85 : vector<2x384xf32>
    %88 = arith.divf %86, %87 : vector<2x384xf32>
    %89 = vector.extract_strided_slice %82 {offsets = [0, 384], sizes = [2, 128], strides = [1, 1]} : vector<2x512xf32> to vector<2x128xf32>
    %90 = math.tanh %89 : vector<2x128xf32>
    %91 = vector.extract_strided_slice %88 {offsets = [0, 0], sizes = [2, 128], strides = [1, 1]} : vector<2x384xf32> to vector<2x128xf32>
    %92 = vector.extract_strided_slice %88 {offsets = [0, 128], sizes = [2, 128], strides = [1, 1]} : vector<2x384xf32> to vector<2x128xf32>
    %93 = vector.extract_strided_slice %88 {offsets = [0, 256], sizes = [2, 128], strides = [1, 1]} : vector<2x384xf32> to vector<2x128xf32>
    %94 = arith.mulf %92, %77 : vector<2x128xf32>
    %95 = arith.mulf %91, %90 : vector<2x128xf32>
    %96 = arith.addf %94, %95 : vector<2x128xf32>
    %97 = math.tanh %96 : vector<2x128xf32>
    %98 = arith.mulf %93, %97 : vector<2x128xf32>
    %c8 = arith.constant 8 : index
    %c0_26 = arith.constant 0 : index
    %99 = vector.load %arg6[%c8, %c0_26] : memref<16x512xf32, #tpu.memory_space<vmem>>, vector<2x512xf32>
    %cst_27 = arith.constant dense<0.000000e+00> : vector<2x512xf32>
    %100 = tpu.matmul %98, %20, %cst_27 {dimension_numbers = #tpu.dot_dimension_numbers<[1], [0], [0], [1], [0, 0, 1, 1], [], []>} : vector<2x128xf32>, vector<128x512xf32>, vector<2x512xf32> -> vector<2x512xf32>
    %101 = arith.addf %99, %100 : vector<2x512xf32>
    %102 = vector.extract_strided_slice %101 {offsets = [0, 0], sizes = [2, 384], strides = [1, 1]} : vector<2x512xf32> to vector<2x384xf32>
    %103 = arith.negf %102 : vector<2x384xf32>
    %104 = math.exp %103 : vector<2x384xf32>
    %cst_28 = arith.constant 1.000000e+00 : f32
    %105 = vector.broadcast %cst_28 : f32 to vector<2x384xf32>
    %106 = arith.addf %105, %104 : vector<2x384xf32>
    %107 = arith.divf %105, %106 : vector<2x384xf32>
    %108 = vector.extract_strided_slice %101 {offsets = [0, 384], sizes = [2, 128], strides = [1, 1]} : vector<2x512xf32> to vector<2x128xf32>
    %109 = math.tanh %108 : vector<2x128xf32>
    %110 = vector.extract_strided_slice %107 {offsets = [0, 0], sizes = [2, 128], strides = [1, 1]} : vector<2x384xf32> to vector<2x128xf32>
    %111 = vector.extract_strided_slice %107 {offsets = [0, 128], sizes = [2, 128], strides = [1, 1]} : vector<2x384xf32> to vector<2x128xf32>
    %112 = vector.extract_strided_slice %107 {offsets = [0, 256], sizes = [2, 128], strides = [1, 1]} : vector<2x384xf32> to vector<2x128xf32>
    %113 = arith.mulf %111, %96 : vector<2x128xf32>
    %114 = arith.mulf %110, %109 : vector<2x128xf32>
    %115 = arith.addf %113, %114 : vector<2x128xf32>
    %116 = math.tanh %115 : vector<2x128xf32>
    %117 = arith.mulf %112, %116 : vector<2x128xf32>
    %c10 = arith.constant 10 : index
    %c0_29 = arith.constant 0 : index
    %118 = vector.load %arg6[%c10, %c0_29] : memref<16x512xf32, #tpu.memory_space<vmem>>, vector<2x512xf32>
    %cst_30 = arith.constant dense<0.000000e+00> : vector<2x512xf32>
    %119 = tpu.matmul %117, %20, %cst_30 {dimension_numbers = #tpu.dot_dimension_numbers<[1], [0], [0], [1], [0, 0, 1, 1], [], []>} : vector<2x128xf32>, vector<128x512xf32>, vector<2x512xf32> -> vector<2x512xf32>
    %120 = arith.addf %118, %119 : vector<2x512xf32>
    %121 = vector.extract_strided_slice %120 {offsets = [0, 0], sizes = [2, 384], strides = [1, 1]} : vector<2x512xf32> to vector<2x384xf32>
    %122 = arith.negf %121 : vector<2x384xf32>
    %123 = math.exp %122 : vector<2x384xf32>
    %cst_31 = arith.constant 1.000000e+00 : f32
    %124 = vector.broadcast %cst_31 : f32 to vector<2x384xf32>
    %125 = arith.addf %124, %123 : vector<2x384xf32>
    %126 = arith.divf %124, %125 : vector<2x384xf32>
    %127 = vector.extract_strided_slice %120 {offsets = [0, 384], sizes = [2, 128], strides = [1, 1]} : vector<2x512xf32> to vector<2x128xf32>
    %128 = math.tanh %127 : vector<2x128xf32>
    %129 = vector.extract_strided_slice %126 {offsets = [0, 0], sizes = [2, 128], strides = [1, 1]} : vector<2x384xf32> to vector<2x128xf32>
    %130 = vector.extract_strided_slice %126 {offsets = [0, 128], sizes = [2, 128], strides = [1, 1]} : vector<2x384xf32> to vector<2x128xf32>
    %131 = vector.extract_strided_slice %126 {offsets = [0, 256], sizes = [2, 128], strides = [1, 1]} : vector<2x384xf32> to vector<2x128xf32>
    %132 = arith.mulf %130, %115 : vector<2x128xf32>
    %133 = arith.mulf %129, %128 : vector<2x128xf32>
    %134 = arith.addf %132, %133 : vector<2x128xf32>
    %135 = math.tanh %134 : vector<2x128xf32>
    %136 = arith.mulf %131, %135 : vector<2x128xf32>
    %c12 = arith.constant 12 : index
    %c0_32 = arith.constant 0 : index
    %137 = vector.load %arg6[%c12, %c0_32] : memref<16x512xf32, #tpu.memory_space<vmem>>, vector<2x512xf32>
    %cst_33 = arith.constant dense<0.000000e+00> : vector<2x512xf32>
    %138 = tpu.matmul %136, %20, %cst_33 {dimension_numbers = #tpu.dot_dimension_numbers<[1], [0], [0], [1], [0, 0, 1, 1], [], []>} : vector<2x128xf32>, vector<128x512xf32>, vector<2x512xf32> -> vector<2x512xf32>
    %139 = arith.addf %137, %138 : vector<2x512xf32>
    %140 = vector.extract_strided_slice %139 {offsets = [0, 0], sizes = [2, 384], strides = [1, 1]} : vector<2x512xf32> to vector<2x384xf32>
    %141 = arith.negf %140 : vector<2x384xf32>
    %142 = math.exp %141 : vector<2x384xf32>
    %cst_34 = arith.constant 1.000000e+00 : f32
    %143 = vector.broadcast %cst_34 : f32 to vector<2x384xf32>
    %144 = arith.addf %143, %142 : vector<2x384xf32>
    %145 = arith.divf %143, %144 : vector<2x384xf32>
    %146 = vector.extract_strided_slice %139 {offsets = [0, 384], sizes = [2, 128], strides = [1, 1]} : vector<2x512xf32> to vector<2x128xf32>
    %147 = math.tanh %146 : vector<2x128xf32>
    %148 = vector.extract_strided_slice %145 {offsets = [0, 0], sizes = [2, 128], strides = [1, 1]} : vector<2x384xf32> to vector<2x128xf32>
    %149 = vector.extract_strided_slice %145 {offsets = [0, 128], sizes = [2, 128], strides = [1, 1]} : vector<2x384xf32> to vector<2x128xf32>
    %150 = vector.extract_strided_slice %145 {offsets = [0, 256], sizes = [2, 128], strides = [1, 1]} : vector<2x384xf32> to vector<2x128xf32>
    %151 = arith.mulf %149, %134 : vector<2x128xf32>
    %152 = arith.mulf %148, %147 : vector<2x128xf32>
    %153 = arith.addf %151, %152 : vector<2x128xf32>
    %154 = math.tanh %153 : vector<2x128xf32>
    %155 = arith.mulf %150, %154 : vector<2x128xf32>
    %c0_35 = arith.constant 0 : index
    %c0_36 = arith.constant 0 : index
    %c0_37 = arith.constant 0 : index
    %156 = vector.load %arg5[%c0_35, %c0_36, %c0_37] : memref<2x2x128xf32, #tpu.memory_space<vmem>>, vector<1x2x128xf32>
    %157 = vector.shape_cast %156 : vector<1x2x128xf32> to vector<2x128xf32>
    %158 = vector.shape_cast %155 : vector<2x128xf32> to vector<1x2x128xf32>
    tpu.vector_store %arg5[%c0_35, %c0_36, %c0_37], %158 {strides = array<i32>} : memref<2x2x128xf32, #tpu.memory_space<vmem>>, vector<1x2x128xf32>,
    %c14 = arith.constant 14 : index
    %c0_38 = arith.constant 0 : index
    %159 = vector.load %arg6[%c14, %c0_38] : memref<16x512xf32, #tpu.memory_space<vmem>>, vector<2x512xf32>
    %cst_39 = arith.constant dense<0.000000e+00> : vector<2x512xf32>
    %160 = tpu.matmul %155, %20, %cst_39 {dimension_numbers = #tpu.dot_dimension_numbers<[1], [0], [0], [1], [0, 0, 1, 1], [], []>} : vector<2x128xf32>, vector<128x512xf32>, vector<2x512xf32> -> vector<2x512xf32>
    %161 = arith.addf %159, %160 : vector<2x512xf32>
    %162 = vector.extract_strided_slice %161 {offsets = [0, 0], sizes = [2, 384], strides = [1, 1]} : vector<2x512xf32> to vector<2x384xf32>
    %163 = arith.negf %162 : vector<2x384xf32>
    %164 = math.exp %163 : vector<2x384xf32>
    %cst_40 = arith.constant 1.000000e+00 : f32
    %165 = vector.broadcast %cst_40 : f32 to vector<2x384xf32>
    %166 = arith.addf %165, %164 : vector<2x384xf32>
    %167 = arith.divf %165, %166 : vector<2x384xf32>
    %168 = vector.extract_strided_slice %161 {offsets = [0, 384], sizes = [2, 128], strides = [1, 1]} : vector<2x512xf32> to vector<2x128xf32>
    %169 = math.tanh %168 : vector<2x128xf32>
    %170 = vector.extract_strided_slice %167 {offsets = [0, 0], sizes = [2, 128], strides = [1, 1]} : vector<2x384xf32> to vector<2x128xf32>
    %171 = vector.extract_strided_slice %167 {offsets = [0, 128], sizes = [2, 128], strides = [1, 1]} : vector<2x384xf32> to vector<2x128xf32>
    %172 = vector.extract_strided_slice %167 {offsets = [0, 256], sizes = [2, 128], strides = [1, 1]} : vector<2x384xf32> to vector<2x128xf32>
    %173 = arith.mulf %171, %153 : vector<2x128xf32>
    %174 = arith.mulf %170, %169 : vector<2x128xf32>
    %175 = arith.addf %173, %174 : vector<2x128xf32>
    %176 = math.tanh %175 : vector<2x128xf32>
    %177 = arith.mulf %172, %176 : vector<2x128xf32>
    %c1 = arith.constant 1 : index
    %c0_41 = arith.constant 0 : index
    %c0_42 = arith.constant 0 : index
    %178 = vector.load %arg5[%c1, %c0_41, %c0_42] : memref<2x2x128xf32, #tpu.memory_space<vmem>>, vector<1x2x128xf32>
    %179 = vector.shape_cast %178 : vector<1x2x128xf32> to vector<2x128xf32>
    %180 = vector.shape_cast %177 : vector<2x128xf32> to vector<1x2x128xf32>
    tpu.vector_store %arg5[%c1, %c0_41, %c0_42], %180 {strides = array<i32>} : memref<2x2x128xf32, #tpu.memory_space<vmem>>, vector<1x2x128xf32>,
    %c0_43 = arith.constant 0 : index
    %c0_44 = arith.constant 0 : index
    %181 = vector.load %arg7[%c0_43, %c0_44] : memref<2x128xf32, #tpu.memory_space<vmem>>, vector<2x128xf32>
    tpu.vector_store %arg7[%c0_43, %c0_44], %177 {strides = array<i32>} : memref<2x128xf32, #tpu.memory_space<vmem>>, vector<2x128xf32>,
    %c0_45 = arith.constant 0 : index
    %c0_46 = arith.constant 0 : index
    %182 = vector.load %arg8[%c0_45, %c0_46] : memref<2x128xf32, #tpu.memory_space<vmem>>, vector<2x128xf32>
    tpu.vector_store %arg8[%c0_45, %c0_46], %175 {strides = array<i32>} : memref<2x128xf32, #tpu.memory_space<vmem>>, vector<2x128xf32>,
    return
  }
  func.func @transform_0(%arg0: i32) -> (i32, i32) {
    %c0_i32 = arith.constant 0 : i32
    %c0_i32_0 = arith.constant 0 : i32
    %c0_i32_1 = arith.constant 0 : i32
    return %c0_i32, %c0_i32_0 : i32, i32
  }
  func.func @transform_1(%arg0: i32) -> (i32, i32) {
    %c0_i32 = arith.constant 0 : i32
    %c0_i32_0 = arith.constant 0 : i32
    %c0_i32_1 = arith.constant 0 : i32
    return %c0_i32, %c0_i32_0 : i32, i32
  }
  func.func @transform_2(%arg0: i32) -> (i32, i32) {
    %c0_i32 = arith.constant 0 : i32
    %c0_i32_0 = arith.constant 0 : i32
    %c0_i32_1 = arith.constant 0 : i32
    return %c0_i32, %c0_i32_0 : i32, i32
  }
  func.func @transform_3(%arg0: i32) -> (i32, i32) {
    %c0_i32 = arith.constant 0 : i32
    %c0_i32_0 = arith.constant 0 : i32
    %c0_i32_1 = arith.constant 0 : i32
    return %c0_i32, %c0_i32_0 : i32, i32
  }
  func.func @transform_4(%arg0: i32) -> (i32, i32, i32) {
    %c0_i32 = arith.constant 0 : i32
    %c0_i32_0 = arith.constant 0 : i32
    %c0_i32_1 = arith.constant 0 : i32
    %c0_i32_2 = arith.constant 0 : i32
    return %c0_i32, %c0_i32_0, %c0_i32_1 : i32, i32, i32
  }
}

</mosaic_0001>

<bundles_post_ra>
// kernel: cnn_lstm_forward.1
= control target key start
LH: loop header
LB: loop body
LE: loop exit
PB: predicated region body
PF: predicated region fallthrough
CT: control target
= control target key end

     0   :  { %v3092_v3 = vmov 0.0   ;;  %v2429_v8 = vmov 0   ;;  %s3086_s3 = inlined_call_operand.vmem [shape: f32[128,512], index: 3, kind: input, shape index: {}]   ;;  %s3087_s0 = inlined_call_operand.vmem [shape: f32[16,2], index: 0, kind: input, shape index: {}]   ;;  %s3088_s1 = inlined_call_operand.vmem [shape: f32[2,512], index: 1, kind: input, shape index: {}]   ;;  %s3089_s2 = inlined_call_operand.vmem [shape: f32[1,512], index: 2, kind: input, shape index: {}]   ;;  %s3090_s4 = inlined_call_operand.vmem [shape: f32[2,2,128], index: 4, kind: output, shape index: {}]  }
   0x1   :  { %v182_v0 = vld [vmem:[%s3086_s3 + $0x8] sm:$0xff]  ;;  %v184_v2 = vld [vmem:[%s3086_s3 + $0x18] sm:$0xff]  ;;  %315 = vmatprep.mubr.f32.mxu0 %v3092_v3  ;;  %21 = vst [vmem:[#allocation3] sm:$0x3] %v3092_v3  ;;  %22 = vst [vmem:[#allocation4] sm:$0x3] %v3092_v3  ;;  %386 = vmatprep.mubr.f32.mxu1 %v3092_v3 }
   0x2   :  { %v186_v1 = vld [vmem:[%s3086_s3 + $0x28] sm:$0xff]  ;;  %v188_v5 = vld [vmem:[%s3086_s3 + $0x38] sm:$0xff]  ;;  %v181_v6 = vld [vmem:[%s3086_s3] sm:$0xff]  ;;  %2296 = vset.pattern.permute.xlu0 %v2429_v8  ;;  %2298 = vset.pattern.permute.xlu1 %v2429_v8 }
   0x3   :  { %v2469_v4 = vpack.c.bf16 %v186_v1, %v182_v0  ;;  %v185_v7 = vld [vmem:[%s3086_s3 + $0x20] sm:$0xff]  ;;  %v2480_v9 = vpack.c.bf16 %v188_v5, %v184_v2  ;;  %v183_v11 = vld [vmem:[%s3086_s3 + $0x10] sm:$0xff]  ;;  %v190_v13 = vld [vmem:[%s3086_s3 + $0x48] sm:$0xff] }
   0x4   :  { %v2482_v10 = vpack.c.bf16 %v185_v7, %v181_v6  ;;  %v187_v12 = vld [vmem:[%s3086_s3 + $0x30] sm:$0xff]  ;;  %v194_v15 = vld [vmem:[%s3086_s3 + $0x68] sm:$0xff]  ;;  %v192_v16 = vld [vmem:[%s3086_s3 + $0x58] sm:$0xff] }
   0x5   :  { %1782 = vmatprep.subr.bf16.mxu0 %v2469_v4  ;;  %v2494_v14 = vpack.c.bf16 %v187_v12, %v183_v11  ;;  %v196_v17 = vld [vmem:[%s3086_s3 + $0x78] sm:$0xff]  ;;  %1814 = vmatprep.subr.bf16.mxu1 %v2480_v9  ;;  %v2507_v18 = vpack.c.bf16 %v194_v15, %v190_v13  ;;  %v189_v20 = vld [vmem:[%s3086_s3 + $0x40] sm:$0xff]  ;;  %v191_v22 = vld [vmem:[%s3086_s3 + $0x50] sm:$0xff] }
   0x6   :  { %1784 = vmatpush1.bf16.msra.mxu0 %v2482_v10  ;;  %v2509_v19 = vpack.c.bf16 %v196_v17, %v192_v16  ;;  %v193_v21 = vld [vmem:[%s3086_s3 + $0x60] sm:$0xff]  ;;  %v195_v24 = vld [vmem:[%s3086_s3 + $0x70] sm:$0xff]  ;;  %v198_v25 = vld [vmem:[%s3086_s3 + $0x88] sm:$0xff] }
   0x7   :  { %1816 = vmatpush1.bf16.msra.mxu1 %v2494_v14  ;;  %v2521_v23 = vpack.c.bf16 %v193_v21, %v189_v20  ;;  %v202_v26 = vld [vmem:[%s3086_s3 + $0xa8] sm:$0xff]  ;;  %1786 = vmatprep.subr.bf16.mxu0 %v2507_v18  ;;  %v2534_v27 = vpack.c.bf16 %v195_v24, %v191_v22  ;;  %v200_v29 = vld [vmem:[%s3086_s3 + $0x98] sm:$0xff]  ;;  %v197_v31 = vld [vmem:[%s3086_s3 + $0x80] sm:$0xff] }
   0x8   :  { %1818 = vmatprep.subr.bf16.mxu1 %v2509_v19  ;;  %v2536_v28 = vpack.c.bf16 %v202_v26, %v198_v25  ;;  %v204_v30 = vld [vmem:[%s3086_s3 + $0xb8] sm:$0xff]  ;;  %v201_v33 = vld [vmem:[%s3086_s3 + $0xa0] sm:$0xff]  ;;  %v199_v34 = vld [vmem:[%s3086_s3 + $0x90] sm:$0xff] }
   0x9   :  { %v2547_v32 = vpack.c.bf16 %v204_v30, %v200_v29  ;;  %v203_v35 = vld [vmem:[%s3086_s3 + $0xb0] sm:$0xff]  ;;  %v2559_v36 = vpack.c.bf16 %v201_v33, %v197_v31  ;;  %v206_v37 = vld [vmem:[%s3086_s3 + $0xc8] sm:$0xff]  ;;  %v208_v39 = vld [vmem:[%s3086_s3 + $0xd8] sm:$0xff] }
   0xa   :  { %1788 = vmatpush1.bf16.msra.mxu0 %v2521_v23  ;;  %v210_v38 = vld [vmem:[%s3086_s3 + $0xe8] sm:$0xff]  ;;  %v2572_v40 = vpack.c.bf16 %v203_v35, %v199_v34  ;;  %v212_v42 = vld [vmem:[%s3086_s3 + $0xf8] sm:$0xff]  ;;  %v205_v43 = vld [vmem:[%s3086_s3 + $0xc0] sm:$0xff] }
   0xb   :  { %1820 = vmatpush1.bf16.msra.mxu1 %v2534_v27  ;;  %1790 = vmatprep.subr.bf16.mxu0 %v2536_v28  ;;  %v2574_v41 = vpack.c.bf16 %v210_v38, %v206_v37  ;;  %v209_v44 = vld [vmem:[%s3086_s3 + $0xe0] sm:$0xff]  ;;  %v2586_v45 = vpack.c.bf16 %v212_v42, %v208_v39  ;;  %v207_v46 = vld [vmem:[%s3086_s3 + $0xd0] sm:$0xff]  ;;  %v214_v48 = vld [vmem:[%s3086_s3 + $0x108] sm:$0xff] }
   0xc   :  { %1822 = vmatprep.subr.bf16.mxu1 %v2547_v32  ;;  %v211_v47 = vld [vmem:[%s3086_s3 + $0xf0] sm:$0xff]  ;;  %v218_v49 = vld [vmem:[%s3086_s3 + $0x128] sm:$0xff]  ;;  %v216_v50 = vld [vmem:[%s3086_s3 + $0x118] sm:$0xff]  ;;  %v2607_v52 = vpack.c.bf16 %v209_v44, %v205_v43 }
   0xd   :  { %v220_v51 = vld [vmem:[%s3086_s3 + $0x138] sm:$0xff]  ;;  %v2611_v53 = vpack.c.bf16 %v211_v47, %v207_v46  ;;  %v2613_v54 = vpack.c.bf16 %v218_v49, %v214_v48  ;;  %v213_v55 = vld [vmem:[%s3086_s3 + $0x100] sm:$0xff]  ;;  %v215_v57 = vld [vmem:[%s3086_s3 + $0x110] sm:$0xff]  ;;  %v3091_v48 = vmov 1  }
   0xe   :  { %1792 = vmatpush1.bf16.msra.mxu0 %v2559_v36  ;;  %v217_v56 = vld [vmem:[%s3086_s3 + $0x120] sm:$0xff]  ;;  %v2625_v58 = vpack.c.bf16 %v220_v51, %v216_v50  ;;  %v219_v59 = vld [vmem:[%s3086_s3 + $0x130] sm:$0xff]  ;;  %v222_v60 = vld [vmem:[%s3086_s3 + $0x148] sm:$0xff] }
   0xf   :  { %1824 = vmatpush1.bf16.msra.mxu1 %v2572_v40  ;;  %1794 = vmatprep.subr.bf16.mxu0 %v2574_v41  ;;  %v226_v61 = vld [vmem:[%s3086_s3 + $0x168] sm:$0xff]  ;;  %v224_v62 = vld [vmem:[%s3086_s3 + $0x158] sm:$0xff]  ;;  %v2643_v0 = vpack.c.bf16 %v217_v56, %v213_v55  ;;  %v2647_v1 = vpack.c.bf16 %v219_v59, %v215_v57  ;;  %v221_v5 = vld [vmem:[%s3086_s3 + $0x140] sm:$0xff]  ;;  %v40_v55 = vlaneseq }
  0x10   :  { %1826 = vmatprep.subr.bf16.mxu1 %v2586_v45  ;;  %v228_v63 = vld [vmem:[%s3086_s3 + $0x178] sm:$0xff]  ;;  %v2649_v2 = vpack.c.bf16 %v226_v61, %v222_v60  ;;  %v225_v6 = vld [vmem:[%s3086_s3 + $0x160] sm:$0xff]  ;;  %v223_v7 = vld [vmem:[%s3086_s3 + $0x150] sm:$0xff] }
  0x11   :  { %v2661_v8 = vpack.c.bf16 %v228_v63, %v224_v62  ;;  %v227_v11 = vld [vmem:[%s3086_s3 + $0x170] sm:$0xff]  ;;  %v230_v12 = vld [vmem:[%s3086_s3 + $0x188] sm:$0xff]  ;;  %v232_v15 = vld [vmem:[%s3086_s3 + $0x198] sm:$0xff]  ;;  %v2679_v17 = vpack.c.bf16 %v225_v6, %v221_v5  ;;  %v41_v56 = vshrl.u32 %v40_v55, 7 }
  0x12   :  { %1796 = vmatpush1.bf16.msra.mxu0 %v2607_v52  ;;  %v234_v13 = vld [vmem:[%s3086_s3 + $0x1a8] sm:$0xff]  ;;  %v236_v16 = vld [vmem:[%s3086_s3 + $0x1b8] sm:$0xff]  ;;  %v229_v20 = vld [vmem:[%s3086_s3 + $0x180] sm:$0xff]  ;;  %v2686_v21 = vpack.c.bf16 %v227_v11, %v223_v7 }
  0x13   :  { %1828 = vmatpush1.bf16.msra.mxu1 %v2611_v53  ;;  %1798 = vmatprep.subr.bf16.mxu0 %v2613_v54  ;;  %v2688_v22 = vpack.c.bf16 %v234_v13, %v230_v12  ;;  %v233_v24 = vld [vmem:[%s3086_s3 + $0x1a0] sm:$0xff]  ;;  %v231_v25 = vld [vmem:[%s3086_s3 + $0x190] sm:$0xff]  ;;  %v2700_v29 = vpack.c.bf16 %v236_v16, %v232_v15  ;;  %v238_v31 = vld [vmem:[%s3086_s3 + $0x1c8] sm:$0xff]  ;;  %v42_v57 = vsub.s32 0, %v41_v56  ;;  %v46_v59 = vsub.s32 2, %v41_v56 }
  0x14   :  { %1830 = vmatprep.subr.bf16.mxu1 %v2625_v58  ;;  %v25_v26 = vld [vmem:[%s3087_s0] sm:$0xff]  ;;  %v235_v30 = vld [vmem:[%s3086_s3 + $0x1b0] sm:$0xff]  ;;  %v242_v33 = vld [vmem:[%s3086_s3 + $0x1e8] sm:$0xff]  ;;  %v2718_v37 = vpack.c.bf16 %v233_v24, %v229_v20  ;;  %v50_v60 = vsub.s32 4, %v41_v56  ;;  %v54_v61 = vsub.s32 6, %v41_v56  ;;  %v94_v63 = vsub.s32 1, %v41_v56 }
  0x15   :  { %31 = vperm.xlu0 %2296, %v25_v26   ;;  %v240_v34 = vld [vmem:[%s3086_s3 + $0x1d8] sm:$0xff]  ;;  %v2722_v38 = vpack.c.bf16 %v235_v30, %v231_v25  ;;  %v2724_v39 = vpack.c.bf16 %v242_v33, %v238_v31  ;;  %v237_v42 = vld [vmem:[%s3086_s3 + $0x1c0] sm:$0xff]  ;;  %v239_v46 = vld [vmem:[%s3086_s3 + $0x1d0] sm:$0xff]  ;;  %v98_v5 = vsub.s32 3, %v41_v56  ;;  %v102_v6 = vsub.s32 5, %v41_v56 }
  0x16   :  { %1800 = vmatpush1.bf16.msra.mxu0 %v2643_v0  ;;  %v244_v35 = vld [vmem:[%s3086_s3 + $0x1f8] sm:$0xff]  ;;  %v241_v43 = vld [vmem:[%s3086_s3 + $0x1e0] sm:$0xff]  ;;  %v243_v47 = vld [vmem:[%s3086_s3 + $0x1f0] sm:$0xff]  ;;  %v106_v7 = vsub.s32 7, %v41_v56 }
  0x17   :  { %1832 = vmatpush1.bf16.msra.mxu1 %v2647_v1  ;;  %1802 = vmatprep.subr.bf16.mxu0 %v2649_v2  ;;  %v2733_v44 = vpack.c.bf16 %v244_v35, %v240_v34  ;;  %v2743_v49 = vpack.c.bf16 %v241_v43, %v237_v42  ;;  %v2747_v50 = vpack.c.bf16 %v243_v47, %v239_v46  ;;  %v245_v51 = vld [vmem:[#allocation3] sm:$0x3] }
  0x18   :  { %1834 = vmatprep.subr.bf16.mxu1 %v2661_v8  ;;  %v27_v62 = vld [vmem:[%s3088_s1] sm:$0xff] }
  0x19   :  { %2297 = vset.pattern.permute.xlu0 %v3091_v48  ;;  %v43_v11 = vrot.slane %v27_v62, %v42_v57  ;;  %v47_v12 = vrot.slane %v27_v62, %v46_v59  ;;  %v51_v13 = vrot.slane %v27_v62, %v50_v60  ;;  %v55_v15 = vrot.slane %v27_v62, %v54_v61  ;;  %v28_v35 = vld [vmem:[%s3089_s2] sm:$0xf] }
  0x1a   :  { %1804 = vmatpush1.bf16.msra.mxu0 %v2679_v17  ;;  %85 = vperm.xlu0 %2297, %v25_v26   ;;  %v95_v16 = vrot.slane %v27_v62, %v94_v63  ;;  %v99_v20 = vrot.slane %v27_v62, %v98_v5  ;;  %v103_v24 = vrot.slane %v27_v62, %v102_v6 }
  0x1b   :  { %1836 = vmatpush1.bf16.msra.mxu1 %v2686_v21  ;;  %1806 = vmatprep.subr.bf16.mxu0 %v2688_v22  ;;  %v107_v25 = vrot.slane %v27_v62, %v106_v7  ;;  %v2791_v26 = vrot.slane %v43_v11, %v42_v57  ;;  %v2793_v30 = vrot.slane %v47_v12, %v42_v57 }
  0x1c   :  { %1838 = vmatprep.subr.bf16.mxu1 %v2700_v29  ;;  %v2795_v31 = vrot.slane %v51_v13, %v42_v57  ;;  %v2797_v33 = vrot.slane %v55_v15, %v42_v57  ;;  %v2802_v42 = vrot.slane %v95_v16, %v94_v63  ;;  %v2804_v43 = vrot.slane %v99_v20, %v94_v63 }
  0x1d   :  { %v2806_v46 = vrot.slane %v103_v24, %v94_v63  ;;  %v2808_v47 = vrot.slane %v107_v25, %v94_v63  ;;  %v2814_v61 = vrot.slane %v28_v35, %v42_v57  ;;  %v2816_v62 = vrot.slane %v28_v35, %v94_v63 }
  0x1e   :  { %1808 = vmatpush1.bf16.msra.mxu0 %v2718_v37  ;;  %v2818_v6 = vrot.slane %v28_v35, %v46_v59  ;;  %v2820_v7 = vrot.slane %v28_v35, %v98_v5 }
  0x1f   :  { %1840 = vmatpush1.bf16.msra.mxu1 %v2722_v38  ;;  %1810 = vmatprep.subr.bf16.mxu0 %v2724_v39  ;;  %3097 = vst [vmem:[#allocation5_spill] sm:$0xff] %v2816_v62 }
  0x20   :  { %1842 = vmatprep.subr.bf16.mxu1 %v2733_v44  ;;  %3098 = vst [vmem:[#allocation6_spill] sm:$0xff] %v2818_v6  ;;  %3099 = vst [vmem:[#allocation7_spill] sm:$0xff] %v2820_v7 }
  0x22   :  { %1812 = vmatpush1.bf16.msra.mxu0 %v2743_v49 }
  0x23   :  { %1844 = vmatpush1.bf16.msra.mxu1 %v2747_v50  ;;  %1846 = vmatprep.subr.bf16.mxu0 %v2469_v4 }
  0x24   :  { %1878 = vmatprep.subr.bf16.mxu1 %v2480_v9 }
  0x25   :  { %316 = vmatmul.mubr.f32.vlgmr.msra.gmra.mrb[0].mxu0 %v245_v51 }
  0x26   :  { %387 = vmatmul.mubr.f32.vlgmr.msra.gmra.mrb[0].mxu1 %v245_v51  ;;  %1848 = vmatpush1.bf16.msra.mxu0 %v2482_v10 }
  0x27   :  { %1880 = vmatpush1.bf16.msra.mxu1 %v2494_v14  ;;  %1850 = vmatprep.subr.bf16.mxu0 %v2507_v18 }
  0x28   :  { %1882 = vmatprep.subr.bf16.mxu1 %v2509_v19  ;;  %489 = vmatprep.mubr.f32.mxu0 %v3092_v3 }
  0x29   :  { %560 = vmatprep.mubr.f32.mxu1 %v3092_v3 }
  0x2a   :  { %1852 = vmatpush1.bf16.msra.mxu0 %v2521_v23 }
  0x2b   :  { %1884 = vmatpush1.bf16.msra.mxu1 %v2534_v27  ;;  %1854 = vmatprep.subr.bf16.mxu0 %v2536_v28 }
  0x2c   :  { %1886 = vmatprep.subr.bf16.mxu1 %v2547_v32 }
  0x2e   :  { %1856 = vmatpush1.bf16.msra.mxu0 %v2559_v36 }
  0x2f   :  { %1888 = vmatpush1.bf16.msra.mxu1 %v2572_v40  ;;  %1858 = vmatprep.subr.bf16.mxu0 %v2574_v41 }
  0x30   :  { %1890 = vmatprep.subr.bf16.mxu1 %v2586_v45 }
  0x32   :  { %1860 = vmatpush1.bf16.msra.mxu0 %v2607_v52 }
  0x33   :  { %1892 = vmatpush1.bf16.msra.mxu1 %v2611_v53  ;;  %1862 = vmatprep.subr.bf16.mxu0 %v2613_v54 }
  0x34   :  { %1894 = vmatprep.subr.bf16.mxu1 %v2625_v58 }
  0x36   :  { %1864 = vmatpush1.bf16.msra.mxu0 %v2643_v0 }
  0x37   :  { %1896 = vmatpush1.bf16.msra.mxu1 %v2647_v1  ;;  %1866 = vmatprep.subr.bf16.mxu0 %v2649_v2 }
  0x38   :  { %1898 = vmatprep.subr.bf16.mxu1 %v2661_v8 }
  0x3a   :  { %1868 = vmatpush1.bf16.msra.mxu0 %v2679_v17 }
  0x3b   :  { %1900 = vmatpush1.bf16.msra.mxu1 %v2686_v21  ;;  %1870 = vmatprep.subr.bf16.mxu0 %v2688_v22 }
  0x3c   :  { %1902 = vmatprep.subr.bf16.mxu1 %v2700_v29 }
  0x3e   :  { %1872 = vmatpush1.bf16.msra.mxu0 %v2718_v37 }
  0x3f   :  { %1904 = vmatpush1.bf16.msra.mxu1 %v2722_v38  ;;  %1874 = vmatprep.subr.bf16.mxu0 %v2724_v39 }
  0x40   :  { %1906 = vmatprep.subr.bf16.mxu1 %v2733_v44 }
  0x42   :  { %1876 = vmatpush1.bf16.msra.mxu0 %v2743_v49 }
  0x43   :  { %1908 = vmatpush1.bf16.msra.mxu1 %v2747_v50  ;;  %1910 = vmatprep.subr.bf16.mxu0 %v2469_v4 }
  0x44   :  { %1942 = vmatprep.subr.bf16.mxu1 %v2480_v9 }
  0x94   :  { %v32_v34 = vpop.permute.xlu0 %31 }
  0x95   :  { %v76_v51 = vmul.f32 %v2791_v26, %v32_v34  ;;  %v77_v55 = vmul.f32 %v2793_v30, %v32_v34  ;;  %v78_v56 = vmul.f32 %v2795_v31, %v32_v34  ;;  %v79_v60 = vmul.f32 %v2797_v33, %v32_v34 }
  0x99   :  { %v86_v11 = vpop.permute.xlu0 %85 }
  0x9a   :  { %v128_v12 = vmul.f32 %v2802_v42, %v86_v11  ;;  %v129_v13 = vmul.f32 %v2804_v43, %v86_v11  ;;  %v130_v15 = vmul.f32 %v2806_v46, %v86_v11  ;;  %v131_v16 = vmul.f32 %v2808_v47, %v86_v11 }
  0x9c   :  { %v136_v20 = vadd.f32 %v128_v12, %v76_v51  ;;  %v137_v24 = vadd.f32 %v129_v13, %v77_v55  ;;  %v138_v25 = vadd.f32 %v130_v15, %v78_v56  ;;  %v139_v57 = vadd.f32 %v131_v16, %v79_v60 }
  0x9e   :  { %v165_v63 = vadd.f32 %v2814_v61, %v136_v20  ;;  %v166_v59 = vadd.f32 %v2816_v62, %v137_v24  ;;  %v167_v5 = vadd.f32 %v2818_v6, %v138_v25  ;;  %v168_v34 = vadd.f32 %v2820_v7, %v139_v57 }
  0xa0   :  { %173 = vst [vmem:[#allocation2] sm:$0xff] %v165_v63  ;;  %174 = vst [vmem:[#allocation2 + $0x8] sm:$0xff] %v166_v59 }
  0xa1   :  { %175 = vst [vmem:[#allocation2 + $0x10] sm:$0xff] %v167_v5  ;;  %176 = vst [vmem:[#allocation2 + $0x18] sm:$0xff] %v168_v34 }
  0xa7   :  { %v247_v35 = vld [vmem:[#allocation2] sm:$0x3]  ;;  %v248_v51 = vld [vmem:[#allocation2 + $0x8] sm:$0x3] }
  0xa8   :  { %v249_v15 = vld [vmem:[#allocation2 + $0x10] sm:$0x3]  ;;  %v250_v24 = vld [vmem:[#allocation2 + $0x18] sm:$0x3] }
  0xf8   :  { %v317_v48 = vpop.f32.mrb[0].mxu0 }
  0xf9   :  { %v393_v3 = vadd.f32 %v317_v48, %v247_v35  ;;  %v388_v11 = vpop.f32.mrb[0].mxu1  ;;  %v319_v55 = vpop.f32.mrb[1].mxu0 }
  0xfa   :  { %v394_v56 = vadd.f32 %v319_v55, %v248_v51  ;;  %v390_v60 = vpop.f32.mrb[1].mxu1  ;;  %v395_v16 = vadd.f32 %v388_v11, %v249_v15 }
  0xfb   :  { %v1756_v12 = vmul.f32 -1.442695, %v393_v3  ;;  %v396_v25 = vadd.f32 %v390_v60, %v250_v24  ;;  %v246_v3 = vld [vmem:[#allocation4] sm:$0x3] }
  0xfc   :  { %v1757_v13 = vmul.f32 -1.442695, %v394_v56  ;;  %v1758_v20 = vmul.f32 -1.442695, %v395_v16  ;;  %v3100_v16 = vmov 0.0  }
  0xfd   :  { %2300 = vpow2.f32 %v1756_v12  ;;  %23 = vst [vmem:[%s3090_s4] sm:$0x3] %v3100_v16  ;;  %24 = vst [vmem:[%s3090_s4 + $0x2] sm:$0x3] %v3100_v16 }
  0xfe   :  { %2302 = vpow2.f32 %v1757_v13 }
  0xff   :  { %2304 = vpow2.f32 %v1758_v20 }
 0x100   :  { %2306 = vtanh.f32 %v396_v25 }
 0x107   :  { %v2301_v57 = vpop.eup %2300 }
 0x108   :  { %v406_v63 = vadd.f32 1.0, %v2301_v57  ;;  %v2303_v59 = vpop.eup %2302 }
 0x109   :  { %v407_v48 = vadd.f32 1.0, %v2303_v59  ;;  %v2305_v5 = vpop.eup %2304  ;;  %v421_v59 = vld [vmem:[#allocation2] sm:$0xc] }
 0x10a   :  { %2308 = vrcp.f32 %v406_v63  ;;  %v2307_v34 = vpop.eup %2306  ;;  %v408_v56 = vadd.f32 1.0, %v2305_v5 }
 0x10b   :  { %2310 = vrcp.f32 %v407_v48 }
 0x10c   :  { %2312 = vrcp.f32 %v408_v56  ;;  %v423_v56 = vld [vmem:[#allocation2 + $0x10] sm:$0xc] }
 0x114   :  { %v2309_v35 = vpop.eup %2308 }
 0x115   :  { %v417_v51 = vmul.f32 %v2309_v35, %v2307_v34  ;;  %v2311_v55 = vpop.eup %2310  ;;  %v422_v34 = vld [vmem:[#allocation2 + $0x8] sm:$0xc] }
 0x116   :  { %v416_v12 = vmul.f32 %v2311_v55, %v246_v3  ;;  %v2313_v60 = vpop.eup %2312 }
 0x118   :  { %v2830_v11 = vadd.f32 %v417_v51, %v416_v12 }
 0x11a   :  { %2314 = vtanh.f32 %v2830_v11 }
 0x124   :  { %v2315_v13 = vpop.eup %2314 }
 0x125   :  { %v420_v15 = vmul.f32 %v2315_v13, %v2313_v60  ;;  %v424_v13 = vld [vmem:[#allocation2 + $0x18] sm:$0xc] }
 0x127   :  { %490 = vmatmul.mubr.f32.vlgmr.msra.gmra.mrb[2].mxu0 %v420_v15  ;;  %561 = vmatmul.mubr.f32.vlgmr.msra.gmra.mrb[2].mxu1 %v420_v15 }
 0x128   :  { %1912 = vmatpush1.bf16.msra.mxu0 %v2482_v10  ;;  %1944 = vmatpush1.bf16.msra.mxu1 %v2494_v14 }
 0x129   :  { %1914 = vmatprep.subr.bf16.mxu0 %v2507_v18  ;;  %1946 = vmatprep.subr.bf16.mxu1 %v2509_v19 }
 0x12a   :  { %681 = vmatprep.mubr.f32.mxu0 %v3100_v16  ;;  %752 = vmatprep.mubr.f32.mxu1 %v3100_v16 }
 0x12c   :  { %1916 = vmatpush1.bf16.msra.mxu0 %v2521_v23  ;;  %1948 = vmatpush1.bf16.msra.mxu1 %v2534_v27 }
 0x12d   :  { %1918 = vmatprep.subr.bf16.mxu0 %v2536_v28  ;;  %1950 = vmatprep.subr.bf16.mxu1 %v2547_v32 }
 0x130   :  { %1920 = vmatpush1.bf16.msra.mxu0 %v2559_v36  ;;  %1952 = vmatpush1.bf16.msra.mxu1 %v2572_v40 }
 0x131   :  { %1922 = vmatprep.subr.bf16.mxu0 %v2574_v41  ;;  %1954 = vmatprep.subr.bf16.mxu1 %v2586_v45 }
 0x134   :  { %1924 = vmatpush1.bf16.msra.mxu0 %v2607_v52  ;;  %1956 = vmatpush1.bf16.msra.mxu1 %v2611_v53 }
 0x135   :  { %1926 = vmatprep.subr.bf16.mxu0 %v2613_v54  ;;  %1958 = vmatprep.subr.bf16.mxu1 %v2625_v58 }
 0x138   :  { %1928 = vmatpush1.bf16.msra.mxu0 %v2643_v0  ;;  %1960 = vmatpush1.bf16.msra.mxu1 %v2647_v1 }
 0x139   :  { %1930 = vmatprep.subr.bf16.mxu0 %v2649_v2  ;;  %1962 = vmatprep.subr.bf16.mxu1 %v2661_v8 }
 0x13c   :  { %1932 = vmatpush1.bf16.msra.mxu0 %v2679_v17  ;;  %1964 = vmatpush1.bf16.msra.mxu1 %v2686_v21 }
 0x13d   :  { %1934 = vmatprep.subr.bf16.mxu0 %v2688_v22  ;;  %1966 = vmatprep.subr.bf16.mxu1 %v2700_v29 }
 0x140   :  { %1936 = vmatpush1.bf16.msra.mxu0 %v2718_v37  ;;  %1968 = vmatpush1.bf16.msra.mxu1 %v2722_v38 }
 0x141   :  { %1938 = vmatprep.subr.bf16.mxu0 %v2724_v39  ;;  %1970 = vmatprep.subr.bf16.mxu1 %v2733_v44 }
 0x144   :  { %1940 = vmatpush1.bf16.msra.mxu0 %v2743_v49  ;;  %1972 = vmatpush1.bf16.msra.mxu1 %v2747_v50 }
 0x145   :  { %1974 = vmatprep.subr.bf16.mxu0 %v2469_v4  ;;  %2006 = vmatprep.subr.bf16.mxu1 %v2480_v9 }
 0x1fa   :  { %v491_v20 = vpop.f32.mrb[2].mxu0  ;;  %v562_v24 = vpop.f32.mrb[2].mxu1 }
 0x1fb   :  { %v571_v25 = vrot.slane %v491_v20, 6  ;;  %v493_v57 = vpop.f32.mrb[3].mxu0  ;;  %v564_v63 = vpop.f32.mrb[3].mxu1  ;;  %v573_v55 = vrot.slane %v562_v24, 6  ;;  %v603_v24 = vrot.slane %v2830_v11, 6 }
 0x1fc   :  { %v572_v48 = vrot.slane %v493_v57, 6  ;;  %v574_v12 = vrot.slane %v564_v63, 6 }
 0x1fd   :  { %v579_v5 = vadd.f32 %v571_v25, %v421_v59  ;;  %v581_v60 = vadd.f32 %v573_v55, %v423_v56 }
 0x1fe   :  { %v580_v35 = vadd.f32 %v572_v48, %v422_v34  ;;  %v582_v15 = vadd.f32 %v574_v12, %v424_v13  ;;  %v610_v13 = vld [vmem:[#allocation2] sm:$0x30] }
 0x1ff   :  { %v1759_v3 = vmul.f32 -1.442695, %v579_v5  ;;  %v1761_v7 = vmul.f32 -1.442695, %v581_v60 }
 0x200   :  { %v1760_v51 = vmul.f32 -1.442695, %v580_v35 }
 0x201   :  { %2316 = vpow2.f32 %v1759_v3 }
 0x202   :  { %2318 = vpow2.f32 %v1760_v51 }
 0x203   :  { %2320 = vtanh.f32 %v582_v15 }
 0x204   :  { %2322 = vpow2.f32 %v1761_v7 }
 0x20b   :  { %v2317_v6 = vpop.eup %2316 }
 0x20c   :  { %v592_v20 = vadd.f32 1.0, %v2317_v6  ;;  %v2319_v62 = vpop.eup %2318 }
 0x20d   :  { %v593_v25 = vadd.f32 1.0, %v2319_v62  ;;  %v2321_v57 = vpop.eup %2320 }
 0x20e   :  { %2324 = vrcp.f32 %v592_v20  ;;  %v2323_v59 = vpop.eup %2322 }
 0x20f   :  { %2326 = vrcp.f32 %v593_v25  ;;  %v594_v63 = vadd.f32 1.0, %v2323_v59  ;;  %v611_v25 = vld [vmem:[#allocation2 + $0x8] sm:$0x30] }
 0x211   :  { %2328 = vrcp.f32 %v594_v63 }
 0x218   :  { %v2325_v48 = vpop.eup %2324 }
 0x219   :  { %v606_v5 = vmul.f32 %v2325_v48, %v2321_v57  ;;  %v2327_v34 = vpop.eup %2326 }
 0x21a   :  { %v605_v35 = vmul.f32 %v2327_v34, %v603_v24 }
 0x21b   :  { %v2329_v6 = vpop.eup %2328 }
 0x21c   :  { %v2868_v3 = vadd.f32 %v606_v5, %v605_v35  ;;  %v612_v5 = vld [vmem:[#allocation2 + $0x10] sm:$0x30]  ;;  %v613_v35 = vld [vmem:[#allocation2 + $0x18] sm:$0x30] }
 0x21e   :  { %2330 = vtanh.f32 %v2868_v3 }
 0x228   :  { %v2331_v51 = vpop.eup %2330 }
 0x229   :  { %v609_v7 = vmul.f32 %v2331_v51, %v2329_v6 }
 0x22b   :  { %v615_v55 = vrot.slane %v609_v7, 2 }
 0x22d   :  { %682 = vmatmul.mubr.f32.vlgmr.msra.gmra.mrb[4].mxu0 %v615_v55  ;;  %753 = vmatmul.mubr.f32.vlgmr.msra.gmra.mrb[4].mxu1 %v615_v55 }
 0x22e   :  { %1976 = vmatpush1.bf16.msra.mxu0 %v2482_v10  ;;  %2008 = vmatpush1.bf16.msra.mxu1 %v2494_v14 }
 0x22f   :  { %1978 = vmatprep.subr.bf16.mxu0 %v2507_v18  ;;  %2010 = vmatprep.subr.bf16.mxu1 %v2509_v19 }
 0x230   :  { %873 = vmatprep.mubr.f32.mxu0 %v3100_v16  ;;  %944 = vmatprep.mubr.f32.mxu1 %v3100_v16 }
 0x232   :  { %1980 = vmatpush1.bf16.msra.mxu0 %v2521_v23  ;;  %2012 = vmatpush1.bf16.msra.mxu1 %v2534_v27 }
 0x233   :  { %1982 = vmatprep.subr.bf16.mxu0 %v2536_v28  ;;  %2014 = vmatprep.subr.bf16.mxu1 %v2547_v32 }
 0x236   :  { %1984 = vmatpush1.bf16.msra.mxu0 %v2559_v36  ;;  %2016 = vmatpush1.bf16.msra.mxu1 %v2572_v40 }
 0x237   :  { %1986 = vmatprep.subr.bf16.mxu0 %v2574_v41  ;;  %2018 = vmatprep.subr.bf16.mxu1 %v2586_v45 }
 0x23a   :  { %1988 = vmatpush1.bf16.msra.mxu0 %v2607_v52  ;;  %2020 = vmatpush1.bf16.msra.mxu1 %v2611_v53 }
 0x23b   :  { %1990 = vmatprep.subr.bf16.mxu0 %v2613_v54  ;;  %2022 = vmatprep.subr.bf16.mxu1 %v2625_v58 }
 0x23e   :  { %1992 = vmatpush1.bf16.msra.mxu0 %v2643_v0  ;;  %2024 = vmatpush1.bf16.msra.mxu1 %v2647_v1 }
 0x23f   :  { %1994 = vmatprep.subr.bf16.mxu0 %v2649_v2  ;;  %2026 = vmatprep.subr.bf16.mxu1 %v2661_v8 }
 0x242   :  { %1996 = vmatpush1.bf16.msra.mxu0 %v2679_v17  ;;  %2028 = vmatpush1.bf16.msra.mxu1 %v2686_v21 }
 0x243   :  { %1998 = vmatprep.subr.bf16.mxu0 %v2688_v22  ;;  %2030 = vmatprep.subr.bf16.mxu1 %v2700_v29 }
 0x246   :  { %2000 = vmatpush1.bf16.msra.mxu0 %v2718_v37  ;;  %2032 = vmatpush1.bf16.msra.mxu1 %v2722_v38 }
 0x247   :  { %2002 = vmatprep.subr.bf16.mxu0 %v2724_v39  ;;  %2034 = vmatprep.subr.bf16.mxu1 %v2733_v44 }
 0x24a   :  { %2004 = vmatpush1.bf16.msra.mxu0 %v2743_v49  ;;  %2036 = vmatpush1.bf16.msra.mxu1 %v2747_v50 }
 0x24b   :  { %2038 = vmatprep.subr.bf16.mxu0 %v2469_v4  ;;  %2070 = vmatprep.subr.bf16.mxu1 %v2480_v9 }
 0x300   :  { %v683_v62 = vpop.f32.mrb[4].mxu0  ;;  %v754_v11 = vpop.f32.mrb[4].mxu1 }
 0x301   :  { %v763_v56 = vrot.slane %v683_v62, 4  ;;  %v685_v12 = vpop.f32.mrb[5].mxu0  ;;  %v756_v60 = vpop.f32.mrb[5].mxu1  ;;  %v765_v24 = vrot.slane %v754_v11, 4  ;;  %v795_v11 = vrot.slane %v2868_v3, 6  ;;  %v26_v3 = vld [vmem:[%s3087_s0 + $0x8] sm:$0xff] }
 0x302   :  { %v764_v15 = vrot.slane %v685_v12, 4  ;;  %v766_v34 = vrot.slane %v756_v60, 4  ;;  %36 = vperm.xlu1 %2298, %v26_v3  }
 0x303   :  { %v771_v20 = vadd.f32 %v763_v56, %v610_v13  ;;  %v773_v63 = vadd.f32 %v765_v24, %v612_v5 }
 0x304   :  { %v772_v57 = vadd.f32 %v764_v15, %v611_v25  ;;  %v774_v6 = vadd.f32 %v766_v34, %v613_v35 }
 0x305   :  { %v1762_v59 = vmul.f32 -1.442695, %v771_v20  ;;  %v1764_v51 = vmul.f32 -1.442695, %v773_v63  ;;  %v3101_v63 = vmov 1  }
 0x306   :  { %v1763_v48 = vmul.f32 -1.442695, %v772_v57  ;;  %2299 = vset.pattern.permute.xlu1 %v3101_v63 }
 0x307   :  { %2332 = vpow2.f32 %v1762_v59  ;;  %89 = vperm.xlu1 %2299, %v26_v3  }
 0x308   :  { %2334 = vpow2.f32 %v1763_v48 }
 0x309   :  { %2336 = vtanh.f32 %v774_v6 }
 0x30a   :  { %2338 = vpow2.f32 %v1764_v51 }
 0x311   :  { %v2333_v7 = vpop.eup %2332 }
 0x312   :  { %v784_v55 = vadd.f32 1.0, %v2333_v7  ;;  %v2335_v62 = vpop.eup %2334 }
 0x313   :  { %v785_v56 = vadd.f32 1.0, %v2335_v62  ;;  %v2337_v12 = vpop.eup %2336  ;;  %v802_v62 = vld [vmem:[#allocation2] sm:$0xc0] }
 0x314   :  { %2340 = vrcp.f32 %v784_v55  ;;  %v2339_v13 = vpop.eup %2338 }
 0x315   :  { %2342 = vrcp.f32 %v785_v56  ;;  %v786_v60 = vadd.f32 1.0, %v2339_v13  ;;  %v803_v13 = vld [vmem:[#allocation2 + $0x8] sm:$0xc0] }
 0x317   :  { %2344 = vrcp.f32 %v786_v60  ;;  %v804_v60 = vld [vmem:[#allocation2 + $0x10] sm:$0xc0] }
 0x31e   :  { %v2341_v15 = vpop.eup %2340 }
 0x31f   :  { %v798_v20 = vmul.f32 %v2341_v15, %v2337_v12  ;;  %v2343_v25 = vpop.eup %2342 }
 0x320   :  { %v797_v57 = vmul.f32 %v2343_v25, %v795_v11 }
 0x321   :  { %v2345_v48 = vpop.eup %2344 }
 0x322   :  { %v2906_v59 = vadd.f32 %v798_v20, %v797_v57 }
 0x324   :  { %2346 = vtanh.f32 %v2906_v59 }
 0x32e   :  { %v2347_v24 = vpop.eup %2346 }
 0x32f   :  { %v801_v5 = vmul.f32 %v2347_v24, %v2345_v48  ;;  %v805_v24 = vld [vmem:[#allocation2 + $0x18] sm:$0xc0] }
 0x331   :  { %v807_v34 = vrot.slane %v801_v5, 4 }
 0x333   :  { %874 = vmatmul.mubr.f32.vlgmr.msra.gmra.mrb[6].mxu0 %v807_v34  ;;  %945 = vmatmul.mubr.f32.vlgmr.msra.gmra.mrb[6].mxu1 %v807_v34 }
 0x334   :  { %2040 = vmatpush1.bf16.msra.mxu0 %v2482_v10  ;;  %2072 = vmatpush1.bf16.msra.mxu1 %v2494_v14 }
 0x335   :  { %2042 = vmatprep.subr.bf16.mxu0 %v2507_v18  ;;  %2074 = vmatprep.subr.bf16.mxu1 %v2509_v19 }
 0x336   :  { %1065 = vmatprep.mubr.f32.mxu0 %v3100_v16  ;;  %1136 = vmatprep.mubr.f32.mxu1 %v3100_v16 }
 0x338   :  { %2044 = vmatpush1.bf16.msra.mxu0 %v2521_v23  ;;  %2076 = vmatpush1.bf16.msra.mxu1 %v2534_v27 }
 0x339   :  { %2046 = vmatprep.subr.bf16.mxu0 %v2536_v28  ;;  %2078 = vmatprep.subr.bf16.mxu1 %v2547_v32 }
 0x33c   :  { %2048 = vmatpush1.bf16.msra.mxu0 %v2559_v36  ;;  %2080 = vmatpush1.bf16.msra.mxu1 %v2572_v40 }
 0x33d   :  { %2050 = vmatprep.subr.bf16.mxu0 %v2574_v41  ;;  %2082 = vmatprep.subr.bf16.mxu1 %v2586_v45 }
 0x340   :  { %2052 = vmatpush1.bf16.msra.mxu0 %v2607_v52  ;;  %2084 = vmatpush1.bf16.msra.mxu1 %v2611_v53 }
 0x341   :  { %2054 = vmatprep.subr.bf16.mxu0 %v2613_v54  ;;  %2086 = vmatprep.subr.bf16.mxu1 %v2625_v58 }
 0x344   :  { %2056 = vmatpush1.bf16.msra.mxu0 %v2643_v0  ;;  %2088 = vmatpush1.bf16.msra.mxu1 %v2647_v1 }
 0x345   :  { %2058 = vmatprep.subr.bf16.mxu0 %v2649_v2  ;;  %2090 = vmatprep.subr.bf16.mxu1 %v2661_v8 }
 0x348   :  { %2060 = vmatpush1.bf16.msra.mxu0 %v2679_v17  ;;  %2092 = vmatpush1.bf16.msra.mxu1 %v2686_v21 }
 0x349   :  { %2062 = vmatprep.subr.bf16.mxu0 %v2688_v22  ;;  %2094 = vmatprep.subr.bf16.mxu1 %v2700_v29 }
 0x34c   :  { %2064 = vmatpush1.bf16.msra.mxu0 %v2718_v37  ;;  %2096 = vmatpush1.bf16.msra.mxu1 %v2722_v38 }
 0x34d   :  { %2066 = vmatprep.subr.bf16.mxu0 %v2724_v39  ;;  %2098 = vmatprep.subr.bf16.mxu1 %v2733_v44 }
 0x350   :  { %2068 = vmatpush1.bf16.msra.mxu0 %v2743_v49  ;;  %2100 = vmatpush1.bf16.msra.mxu1 %v2747_v50 }
 0x351   :  { %2102 = vmatprep.subr.bf16.mxu0 %v2469_v4  ;;  %2134 = vmatprep.subr.bf16.mxu1 %v2480_v9 }
 0x406   :  { %v875_v35 = vpop.f32.mrb[6].mxu0  ;;  %v946_v6 = vpop.f32.mrb[6].mxu1 }
 0x407   :  { %v955_v51 = vrot.slane %v875_v35, 2  ;;  %v877_v7 = vpop.f32.mrb[7].mxu0  ;;  %v948_v55 = vpop.f32.mrb[7].mxu1  ;;  %v957_v25 = vrot.slane %v946_v6, 2  ;;  %v987_v6 = vrot.slane %v2906_v59, 6 }
 0x408   :  { %v956_v56 = vrot.slane %v877_v7, 2  ;;  %v958_v57 = vrot.slane %v948_v55, 2 }
 0x409   :  { %v963_v12 = vadd.f32 %v955_v51, %v802_v62  ;;  %v965_v48 = vadd.f32 %v957_v25, %v804_v60 }
 0x40a   :  { %v964_v15 = vadd.f32 %v956_v56, %v803_v13  ;;  %v966_v5 = vadd.f32 %v958_v57, %v805_v24 }
 0x40b   :  { %v1765_v11 = vmul.f32 -1.442695, %v963_v12  ;;  %v1767_v34 = vmul.f32 -1.442695, %v965_v48  ;;  %v37_v48 = vpop.permute.xlu1 %36 }
 0x40c   :  { %v1766_v20 = vmul.f32 -1.442695, %v964_v15  ;;  %v80_v59 = vmul.f32 %v2791_v26, %v37_v48  ;;  %v81_v24 = vmul.f32 %v2793_v30, %v37_v48 }
 0x40d   :  { %2348 = vpow2.f32 %v1765_v11 }
 0x40e   :  { %2350 = vpow2.f32 %v1766_v20 }
 0x40f   :  { %2352 = vtanh.f32 %v966_v5  ;;  %v82_v5 = vmul.f32 %v2795_v31, %v37_v48 }
 0x410   :  { %2354 = vpow2.f32 %v1767_v34  ;;  %v83_v34 = vmul.f32 %v2797_v33, %v37_v48 }
 0x417   :  { %v2349_v3 = vpop.eup %2348 }
 0x418   :  { %v976_v63 = vadd.f32 1.0, %v2349_v3  ;;  %v2351_v35 = vpop.eup %2350  ;;  %v90_v3 = vpop.permute.xlu1 %89 }
 0x419   :  { %v977_v51 = vadd.f32 1.0, %v2351_v35  ;;  %v2353_v7 = vpop.eup %2352  ;;  %v133_v35 = vmul.f32 %v2804_v43, %v90_v3 }
 0x41a   :  { %2356 = vrcp.f32 %v976_v63  ;;  %v2355_v62 = vpop.eup %2354  ;;  %v132_v63 = vmul.f32 %v2802_v42, %v90_v3 }
 0x41b   :  { %2358 = vrcp.f32 %v977_v51  ;;  %v978_v55 = vadd.f32 1.0, %v2355_v62  ;;  %v134_v51 = vmul.f32 %v2806_v46, %v90_v3  ;;  %v141_v30 = vadd.f32 %v133_v35, %v81_v24  ;;  %v3102_v62 = vld [vmem:[#allocation5_spill] sm:$0xff] }
 0x41c   :  { %v140_v26 = vadd.f32 %v132_v63, %v80_v59 }
 0x41d   :  { %2360 = vrcp.f32 %v978_v55  ;;  %v142_v31 = vadd.f32 %v134_v51, %v82_v5  ;;  %v170_v43 = vadd.f32 %v3102_v62, %v141_v30 }
 0x41e   :  { %v169_v42 = vadd.f32 %v2814_v61, %v140_v26 }
 0x41f   :  { %178 = vst [vmem:[#allocation2 + $0x28] sm:$0xff] %v170_v43 }
 0x420   :  { %177 = vst [vmem:[#allocation2 + $0x20] sm:$0xff] %v169_v42 }
 0x424   :  { %v2357_v56 = vpop.eup %2356 }
 0x425   :  { %v990_v12 = vmul.f32 %v2357_v56, %v2353_v7  ;;  %v2359_v13 = vpop.eup %2358  ;;  %v135_v7 = vmul.f32 %v2808_v47, %v90_v3  ;;  %v3103_v56 = vld [vmem:[#allocation6_spill] sm:$0xff] }
 0x426   :  { %v989_v15 = vmul.f32 %v2359_v13, %v987_v6  ;;  %v171_v46 = vadd.f32 %v3103_v56, %v142_v31  ;;  %v3104_v6 = vld [vmem:[#allocation7_spill] sm:$0xff] }
 0x427   :  { %v2361_v20 = vpop.eup %2360  ;;  %v143_v33 = vadd.f32 %v135_v7, %v83_v34  ;;  %v994_v61 = vld [vmem:[#allocation2 + $0x20] sm:$0x3] }
 0x428   :  { %v2948_v11 = vadd.f32 %v990_v12, %v989_v15  ;;  %179 = vst [vmem:[#allocation2 + $0x30] sm:$0xff] %v171_v46  ;;  %v995_v15 = vld [vmem:[#allocation2 + $0x28] sm:$0x3] }
 0x429   :  { %v172_v47 = vadd.f32 %v3104_v6, %v143_v33 }
 0x42a   :  { %2362 = vtanh.f32 %v2948_v11  ;;  %v1167_v33 = vrot.slane %v2948_v11, 6 }
 0x42b   :  { %180 = vst [vmem:[#allocation2 + $0x38] sm:$0xff] %v172_v47 }
 0x42f   :  { %v996_v59 = vld [vmem:[#allocation2 + $0x30] sm:$0x3] }
 0x432   :  { %v997_v5 = vld [vmem:[#allocation2 + $0x38] sm:$0x3] }
 0x434   :  { %v2363_v25 = vpop.eup %2362 }
 0x435   :  { %v993_v60 = vmul.f32 %v2363_v25, %v2361_v20 }
 0x437   :  { %v999_v57 = vrot.slane %v993_v60, 6 }
 0x439   :  { %1066 = vmatmul.mubr.f32.vlgmr.msra.gmra.mrb[8].mxu0 %v999_v57  ;;  %1137 = vmatmul.mubr.f32.vlgmr.msra.gmra.mrb[8].mxu1 %v999_v57 }
 0x43a   :  { %2104 = vmatpush1.bf16.msra.mxu0 %v2482_v10  ;;  %2136 = vmatpush1.bf16.msra.mxu1 %v2494_v14 }
 0x43b   :  { %2106 = vmatprep.subr.bf16.mxu0 %v2507_v18  ;;  %2138 = vmatprep.subr.bf16.mxu1 %v2509_v19 }
 0x43c   :  { %1242 = vmatprep.mubr.f32.mxu0 %v3100_v16  ;;  %1313 = vmatprep.mubr.f32.mxu1 %v3100_v16 }
 0x43e   :  { %2108 = vmatpush1.bf16.msra.mxu0 %v2521_v23  ;;  %2140 = vmatpush1.bf16.msra.mxu1 %v2534_v27 }
 0x43f   :  { %2110 = vmatprep.subr.bf16.mxu0 %v2536_v28  ;;  %2142 = vmatprep.subr.bf16.mxu1 %v2547_v32 }
 0x442   :  { %2112 = vmatpush1.bf16.msra.mxu0 %v2559_v36  ;;  %2144 = vmatpush1.bf16.msra.mxu1 %v2572_v40 }
 0x443   :  { %2114 = vmatprep.subr.bf16.mxu0 %v2574_v41  ;;  %2146 = vmatprep.subr.bf16.mxu1 %v2586_v45 }
 0x446   :  { %2116 = vmatpush1.bf16.msra.mxu0 %v2607_v52  ;;  %2148 = vmatpush1.bf16.msra.mxu1 %v2611_v53 }
 0x447   :  { %2118 = vmatprep.subr.bf16.mxu0 %v2613_v54  ;;  %2150 = vmatprep.subr.bf16.mxu1 %v2625_v58 }
 0x44a   :  { %2120 = vmatpush1.bf16.msra.mxu0 %v2643_v0  ;;  %2152 = vmatpush1.bf16.msra.mxu1 %v2647_v1 }
 0x44b   :  { %2122 = vmatprep.subr.bf16.mxu0 %v2649_v2  ;;  %2154 = vmatprep.subr.bf16.mxu1 %v2661_v8 }
 0x44e   :  { %2124 = vmatpush1.bf16.msra.mxu0 %v2679_v17  ;;  %2156 = vmatpush1.bf16.msra.mxu1 %v2686_v21 }
 0x44f   :  { %2126 = vmatprep.subr.bf16.mxu0 %v2688_v22  ;;  %2158 = vmatprep.subr.bf16.mxu1 %v2700_v29 }
 0x452   :  { %2128 = vmatpush1.bf16.msra.mxu0 %v2718_v37  ;;  %2160 = vmatpush1.bf16.msra.mxu1 %v2722_v38 }
 0x453   :  { %2130 = vmatprep.subr.bf16.mxu0 %v2724_v39  ;;  %2162 = vmatprep.subr.bf16.mxu1 %v2733_v44 }
 0x456   :  { %2132 = vmatpush1.bf16.msra.mxu0 %v2743_v49  ;;  %2164 = vmatpush1.bf16.msra.mxu1 %v2747_v50 }
 0x457   :  { %2166 = vmatprep.subr.bf16.mxu0 %v2469_v4  ;;  %2198 = vmatprep.subr.bf16.mxu1 %v2480_v9 }
 0x50c   :  { %v1067_v12 = vpop.f32.mrb[8].mxu0  ;;  %v1138_v13 = vpop.f32.mrb[8].mxu1 }
 0x50d   :  { %v1143_v55 = vadd.f32 %v1067_v12, %v994_v61  ;;  %v1069_v20 = vpop.f32.mrb[9].mxu0  ;;  %v1140_v25 = vpop.f32.mrb[9].mxu1  ;;  %v1145_v24 = vadd.f32 %v1138_v13, %v996_v59 }
 0x50e   :  { %v1144_v60 = vadd.f32 %v1069_v20, %v995_v15  ;;  %v1146_v34 = vadd.f32 %v1140_v25, %v997_v5  ;;  %v1174_v20 = vld [vmem:[#allocation2 + $0x20] sm:$0xc] }
 0x50f   :  { %v1768_v57 = vmul.f32 -1.442695, %v1143_v55  ;;  %v1770_v3 = vmul.f32 -1.442695, %v1145_v24 }
 0x510   :  { %v1769_v48 = vmul.f32 -1.442695, %v1144_v60 }
 0x511   :  { %2364 = vpow2.f32 %v1768_v57  ;;  %v1175_v57 = vld [vmem:[#allocation2 + $0x28] sm:$0xc] }
 0x512   :  { %2366 = vpow2.f32 %v1769_v48 }
 0x513   :  { %2368 = vtanh.f32 %v1146_v34  ;;  %v1176_v34 = vld [vmem:[#allocation2 + $0x30] sm:$0xc] }
 0x514   :  { %2370 = vpow2.f32 %v1770_v3 }
 0x51b   :  { %v2365_v63 = vpop.eup %2364 }
 0x51c   :  { %v1156_v35 = vadd.f32 1.0, %v2365_v63  ;;  %v2367_v51 = vpop.eup %2366  ;;  %v1177_v63 = vld [vmem:[#allocation2 + $0x38] sm:$0xc] }
 0x51d   :  { %v1157_v7 = vadd.f32 1.0, %v2367_v51  ;;  %v2369_v26 = vpop.eup %2368 }
 0x51e   :  { %2372 = vrcp.f32 %v1156_v35  ;;  %v2371_v30 = vpop.eup %2370 }
 0x51f   :  { %2374 = vrcp.f32 %v1157_v7  ;;  %v1158_v43 = vadd.f32 1.0, %v2371_v30 }
 0x521   :  { %2376 = vrcp.f32 %v1158_v43 }
 0x528   :  { %v2373_v31 = vpop.eup %2372 }
 0x529   :  { %v1170_v42 = vmul.f32 %v2373_v31, %v2369_v26  ;;  %v2375_v62 = vpop.eup %2374 }
 0x52a   :  { %v1169_v56 = vmul.f32 %v2375_v62, %v1167_v33 }
 0x52b   :  { %v2377_v6 = vpop.eup %2376 }
 0x52c   :  { %v2998_v46 = vadd.f32 %v1170_v42, %v1169_v56 }
 0x52e   :  { %2378 = vtanh.f32 %v2998_v46  ;;  %v1356_v62 = vrot.slane %v2998_v46, 6 }
 0x538   :  { %v2379_v47 = vpop.eup %2378 }
 0x539   :  { %v1173_v61 = vmul.f32 %v2379_v47, %v2377_v6 }
 0x53b   :  { %1243 = vmatmul.mubr.f32.vlgmr.msra.gmra.mrb[10].mxu0 %v1173_v61  ;;  %1314 = vmatmul.mubr.f32.vlgmr.msra.gmra.mrb[10].mxu1 %v1173_v61 }
 0x53c   :  { %2168 = vmatpush1.bf16.msra.mxu0 %v2482_v10  ;;  %2200 = vmatpush1.bf16.msra.mxu1 %v2494_v14 }
 0x53d   :  { %2170 = vmatprep.subr.bf16.mxu0 %v2507_v18  ;;  %2202 = vmatprep.subr.bf16.mxu1 %v2509_v19 }
 0x53e   :  { %1434 = vmatprep.mubr.f32.mxu0 %v3100_v16  ;;  %1505 = vmatprep.mubr.f32.mxu1 %v3100_v16 }
 0x540   :  { %2172 = vmatpush1.bf16.msra.mxu0 %v2521_v23  ;;  %2204 = vmatpush1.bf16.msra.mxu1 %v2534_v27 }
 0x541   :  { %2174 = vmatprep.subr.bf16.mxu0 %v2536_v28  ;;  %2206 = vmatprep.subr.bf16.mxu1 %v2547_v32 }
 0x544   :  { %2176 = vmatpush1.bf16.msra.mxu0 %v2559_v36  ;;  %2208 = vmatpush1.bf16.msra.mxu1 %v2572_v40 }
 0x545   :  { %2178 = vmatprep.subr.bf16.mxu0 %v2574_v41  ;;  %2210 = vmatprep.subr.bf16.mxu1 %v2586_v45 }
 0x548   :  { %2180 = vmatpush1.bf16.msra.mxu0 %v2607_v52  ;;  %2212 = vmatpush1.bf16.msra.mxu1 %v2611_v53 }
 0x549   :  { %2182 = vmatprep.subr.bf16.mxu0 %v2613_v54  ;;  %2214 = vmatprep.subr.bf16.mxu1 %v2625_v58 }
 0x54c   :  { %2184 = vmatpush1.bf16.msra.mxu0 %v2643_v0  ;;  %2216 = vmatpush1.bf16.msra.mxu1 %v2647_v1 }
 0x54d   :  { %2186 = vmatprep.subr.bf16.mxu0 %v2649_v2  ;;  %2218 = vmatprep.subr.bf16.mxu1 %v2661_v8 }
 0x550   :  { %2188 = vmatpush1.bf16.msra.mxu0 %v2679_v17  ;;  %2220 = vmatpush1.bf16.msra.mxu1 %v2686_v21 }
 0x551   :  { %2190 = vmatprep.subr.bf16.mxu0 %v2688_v22  ;;  %2222 = vmatprep.subr.bf16.mxu1 %v2700_v29 }
 0x554   :  { %2192 = vmatpush1.bf16.msra.mxu0 %v2718_v37  ;;  %2224 = vmatpush1.bf16.msra.mxu1 %v2722_v38 }
 0x555   :  { %2194 = vmatprep.subr.bf16.mxu0 %v2724_v39  ;;  %2226 = vmatprep.subr.bf16.mxu1 %v2733_v44 }
 0x558   :  { %2196 = vmatpush1.bf16.msra.mxu0 %v2743_v49  ;;  %2228 = vmatpush1.bf16.msra.mxu1 %v2747_v50 }
 0x559   :  { %2230 = vmatprep.subr.bf16.mxu0 %v2469_v4  ;;  %2262 = vmatprep.subr.bf16.mxu1 %v2480_v9 }
 0x60e   :  { %v1244_v11 = vpop.f32.mrb[10].mxu0  ;;  %v1315_v12 = vpop.f32.mrb[10].mxu1 }
 0x60f   :  { %v1324_v13 = vrot.slane %v1244_v11, 6  ;;  %v1246_v55 = vpop.f32.mrb[11].mxu0  ;;  %v1317_v15 = vpop.f32.mrb[11].mxu1  ;;  %v1326_v5 = vrot.slane %v1315_v12, 6 }
 0x610   :  { %v1325_v25 = vrot.slane %v1246_v55, 6  ;;  %v1327_v3 = vrot.slane %v1317_v15, 6 }
 0x611   :  { %v1332_v60 = vadd.f32 %v1324_v13, %v1174_v20  ;;  %v1334_v4 = vadd.f32 %v1326_v5, %v1176_v34  ;;  %v1556_v34 = vld [vmem:[#allocation2 + $0x20] sm:$0xc0] }
 0x612   :  { %v1333_v48 = vadd.f32 %v1325_v25, %v1175_v57  ;;  %v1335_v9 = vadd.f32 %v1327_v3, %v1177_v63  ;;  %v1557_v63 = vld [vmem:[#allocation2 + $0x28] sm:$0xc0] }
 0x613   :  { %v1771_v59 = vmul.f32 -1.442695, %v1332_v60  ;;  %v1773_v35 = vmul.f32 -1.442695, %v1334_v4 }
 0x614   :  { %v1772_v24 = vmul.f32 -1.442695, %v1333_v48 }
 0x615   :  { %2380 = vpow2.f32 %v1771_v59 }
 0x616   :  { %2382 = vpow2.f32 %v1772_v24 }
 0x617   :  { %2384 = vtanh.f32 %v1335_v9 }
 0x618   :  { %2386 = vpow2.f32 %v1773_v35 }
 0x61f   :  { %v2381_v51 = vpop.eup %2380 }
 0x620   :  { %v1345_v7 = vadd.f32 1.0, %v2381_v51  ;;  %v2383_v26 = vpop.eup %2382 }
 0x621   :  { %v1346_v30 = vadd.f32 1.0, %v2383_v26  ;;  %v2385_v31 = vpop.eup %2384  ;;  %v1558_v26 = vld [vmem:[#allocation2 + $0x30] sm:$0xc0] }
 0x622   :  { %2388 = vrcp.f32 %v1345_v7  ;;  %v2387_v33 = vpop.eup %2386 }
 0x623   :  { %2390 = vrcp.f32 %v1346_v30  ;;  %v1347_v6 = vadd.f32 1.0, %v2387_v33  ;;  %v1559_v33 = vld [vmem:[#allocation2 + $0x38] sm:$0xc0] }
 0x625   :  { %2392 = vrcp.f32 %v1347_v6 }
 0x62c   :  { %v2389_v42 = vpop.eup %2388 }
 0x62d   :  { %v1359_v43 = vmul.f32 %v2389_v42, %v2385_v31  ;;  %v2391_v56 = vpop.eup %2390 }
 0x62e   :  { %v1358_v47 = vmul.f32 %v2391_v56, %v1356_v62 }
 0x62f   :  { %v2393_v11 = vpop.eup %2392 }
 0x630   :  { %v3036_v61 = vadd.f32 %v1359_v43, %v1358_v47 }
 0x632   :  { %2394 = vtanh.f32 %v3036_v61 }
 0x63c   :  { %v2395_v12 = vpop.eup %2394 }
 0x63d   :  { %v1362_v13 = vmul.f32 %v2395_v12, %v2393_v11 }
 0x63f   :  { %v1368_v55 = vrot.slane %v1362_v13, 2 }
 0x641   :  { %1435 = vmatmul.mubr.f32.vlgmr.msra.gmra.mrb[12].mxu0 %v1368_v55  ;;  %1506 = vmatmul.mubr.f32.vlgmr.msra.gmra.mrb[12].mxu1 %v1368_v55 }
 0x642   :  { %2232 = vmatpush1.bf16.msra.mxu0 %v2482_v10  ;;  %2264 = vmatpush1.bf16.msra.mxu1 %v2494_v14 }
 0x643   :  { %2234 = vmatprep.subr.bf16.mxu0 %v2507_v18  ;;  %2266 = vmatprep.subr.bf16.mxu1 %v2509_v19 }
 0x644   :  { %1627 = vmatprep.mubr.f32.mxu0 %v3100_v16  ;;  %1698 = vmatprep.mubr.f32.mxu1 %v3100_v16 }
 0x646   :  { %2236 = vmatpush1.bf16.msra.mxu0 %v2521_v23  ;;  %2268 = vmatpush1.bf16.msra.mxu1 %v2534_v27  ;;  %v1363_v27 = vld [vmem:[#allocation2 + $0x20] sm:$0x30] }
 0x647   :  { %2238 = vmatprep.subr.bf16.mxu0 %v2536_v28  ;;  %2270 = vmatprep.subr.bf16.mxu1 %v2547_v32 }
 0x64a   :  { %2240 = vmatpush1.bf16.msra.mxu0 %v2559_v36  ;;  %2272 = vmatpush1.bf16.msra.mxu1 %v2572_v40  ;;  %v1364_v36 = vld [vmem:[#allocation2 + $0x28] sm:$0x30] }
 0x64b   :  { %2242 = vmatprep.subr.bf16.mxu0 %v2574_v41  ;;  %2274 = vmatprep.subr.bf16.mxu1 %v2586_v45 }
 0x64e   :  { %2244 = vmatpush1.bf16.msra.mxu0 %v2607_v52  ;;  %2276 = vmatpush1.bf16.msra.mxu1 %v2611_v53  ;;  %v1365_v53 = vld [vmem:[#allocation2 + $0x30] sm:$0x30] }
 0x64f   :  { %2246 = vmatprep.subr.bf16.mxu0 %v2613_v54  ;;  %2278 = vmatprep.subr.bf16.mxu1 %v2625_v58 }
 0x652   :  { %2248 = vmatpush1.bf16.msra.mxu0 %v2643_v0  ;;  %2280 = vmatpush1.bf16.msra.mxu1 %v2647_v1  ;;  %v1366_v0 = vld [vmem:[#allocation2 + $0x38] sm:$0x30] }
 0x653   :  { %2250 = vmatprep.subr.bf16.mxu0 %v2649_v2  ;;  %2282 = vmatprep.subr.bf16.mxu1 %v2661_v8 }
 0x656   :  { %2252 = vmatpush1.bf16.msra.mxu0 %v2679_v17  ;;  %2284 = vmatpush1.bf16.msra.mxu1 %v2686_v21 }
 0x657   :  { %2254 = vmatprep.subr.bf16.mxu0 %v2688_v22  ;;  %2286 = vmatprep.subr.bf16.mxu1 %v2700_v29 }
 0x65a   :  { %2256 = vmatpush1.bf16.msra.mxu0 %v2718_v37  ;;  %2288 = vmatpush1.bf16.msra.mxu1 %v2722_v38 }
 0x65b   :  { %2258 = vmatprep.subr.bf16.mxu0 %v2724_v39  ;;  %2290 = vmatprep.subr.bf16.mxu1 %v2733_v44  ;;  %v1548_v39 = vrot.slane %v3036_v61, 6 }
 0x65e   :  { %2260 = vmatpush1.bf16.msra.mxu0 %v2743_v49  ;;  %2292 = vmatpush1.bf16.msra.mxu1 %v2747_v50 }
 0x714   :  { %v1436_v10 = vpop.f32.mrb[12].mxu0  ;;  %v1507_v14 = vpop.f32.mrb[12].mxu1 }
 0x715   :  { %v1516_v18 = vrot.slane %v1436_v10, 4  ;;  %v1438_v19 = vpop.f32.mrb[13].mxu0  ;;  %v1509_v23 = vpop.f32.mrb[13].mxu1  ;;  %v1518_v52 = vrot.slane %v1507_v14, 4 }
 0x716   :  { %v1517_v28 = vrot.slane %v1438_v19, 4  ;;  %v1519_v54 = vrot.slane %v1509_v23, 4 }
 0x717   :  { %v1524_v32 = vadd.f32 %v1516_v18, %v1363_v27  ;;  %v1526_v58 = vadd.f32 %v1518_v52, %v1365_v53 }
 0x718   :  { %v1525_v40 = vadd.f32 %v1517_v28, %v1364_v36  ;;  %v1527_v1 = vadd.f32 %v1519_v54, %v1366_v0 }
 0x719   :  { %v1774_v41 = vmul.f32 -1.442695, %v1524_v32  ;;  %v1776_v2 = vmul.f32 -1.442695, %v1526_v58 }
 0x71a   :  { %v1775_v45 = vmul.f32 -1.442695, %v1525_v40 }
 0x71b   :  { %2396 = vpow2.f32 %v1774_v41 }
 0x71c   :  { %2398 = vpow2.f32 %v1775_v45 }
 0x71d   :  { %2400 = vtanh.f32 %v1527_v1 }
 0x71e   :  { %2402 = vpow2.f32 %v1776_v2 }
 0x725   :  { %v2397_v8 = vpop.eup %2396 }
 0x726   :  { %v1537_v17 = vadd.f32 1.0, %v2397_v8  ;;  %v2399_v21 = vpop.eup %2398 }
 0x727   :  { %v1538_v22 = vadd.f32 1.0, %v2399_v21  ;;  %v2401_v29 = vpop.eup %2400 }
 0x728   :  { %2404 = vrcp.f32 %v1537_v17  ;;  %v2403_v37 = vpop.eup %2402 }
 0x729   :  { %2406 = vrcp.f32 %v1538_v22  ;;  %v1539_v50 = vadd.f32 1.0, %v2403_v37 }
 0x72b   :  { %2408 = vrcp.f32 %v1539_v50 }
 0x732   :  { %v2405_v38 = vpop.eup %2404 }
 0x733   :  { %v1551_v44 = vmul.f32 %v2405_v38, %v2401_v29  ;;  %v2407_v49 = vpop.eup %2406 }
 0x734   :  { %v1550_v16 = vmul.f32 %v2407_v49, %v1548_v39 }
 0x735   :  { %v2409_v15 = vpop.eup %2408 }
 0x736   :  { %v1552_v46 = vadd.f32 %v1551_v44, %v1550_v16 }
 0x738   :  { %2410 = vtanh.f32 %v1552_v46  ;;  %v1741_v13 = vrot.slane %v1552_v46, 6 }
 0x742   :  { %v2411_v20 = vpop.eup %2410 }
 0x743   :  { %v1554_v25 = vmul.f32 %v2411_v20, %v2409_v15 }
 0x745   :  { %1555 = vst [vmem:[%s3090_s4 - $0x4] sm:$0x30] %v1554_v25  ;;  %v1561_v60 = vrot.slane %v1554_v25, 4 }
 0x747   :  { %1628 = vmatmul.mubr.f32.vlgmr.msra.gmra.mrb[14].mxu0 %v1561_v60  ;;  %1699 = vmatmul.mubr.f32.vlgmr.msra.gmra.mrb[14].mxu1 %v1561_v60 }
 0x81a   :  { %v1629_v57 = vpop.f32.mrb[14].mxu0  ;;  %v1700_v48 = vpop.f32.mrb[14].mxu1 }
 0x81b   :  { %v1709_v59 = vrot.slane %v1629_v57, 2  ;;  %v1631_v24 = vpop.f32.mrb[15].mxu0  ;;  %v1702_v5 = vpop.f32.mrb[15].mxu1  ;;  %v1711_v7 = vrot.slane %v1700_v48, 2 }
 0x81c   :  { %v1710_v3 = vrot.slane %v1631_v24, 2  ;;  %v1712_v30 = vrot.slane %v1702_v5, 2 }
 0x81d   :  { %v1717_v4 = vadd.f32 %v1709_v59, %v1556_v34  ;;  %v1719_v31 = vadd.f32 %v1711_v7, %v1558_v26 }
 0x81e   :  { %v1718_v9 = vadd.f32 %v1710_v3, %v1557_v63  ;;  %v1720_v42 = vadd.f32 %v1712_v30, %v1559_v33 }
 0x81f   :  { %v1777_v35 = vmul.f32 -1.442695, %v1717_v4  ;;  %v1779_v62 = vmul.f32 -1.442695, %v1719_v31 }
 0x820   :  { %v1778_v51 = vmul.f32 -1.442695, %v1718_v9 }
 0x821   :  { %2412 = vpow2.f32 %v1777_v35 }
 0x822   :  { %2414 = vpow2.f32 %v1778_v51 }
 0x823   :  { %2416 = vtanh.f32 %v1720_v42 }
 0x824   :  { %2418 = vpow2.f32 %v1779_v62 }
 0x82b   :  { %v2413_v43 = vpop.eup %2412 }
 0x82c   :  { %v1730_v56 = vadd.f32 1.0, %v2413_v43  ;;  %v2415_v6 = vpop.eup %2414 }
 0x82d   :  { %v1731_v47 = vadd.f32 1.0, %v2415_v6  ;;  %v2417_v61 = vpop.eup %2416 }
 0x82e   :  { %2420 = vrcp.f32 %v1730_v56  ;;  %v2419_v11 = vpop.eup %2418 }
 0x82f   :  { %2422 = vrcp.f32 %v1731_v47  ;;  %v1732_v14 = vadd.f32 1.0, %v2419_v11 }
 0x831   :  { %2424 = vrcp.f32 %v1732_v14 }
 0x838   :  { %v2421_v12 = vpop.eup %2420 }
 0x839   :  { %v1744_v55 = vmul.f32 %v2421_v12, %v2417_v61  ;;  %v2423_v10 = vpop.eup %2422 }
 0x83a   :  { %v1743_v18 = vmul.f32 %v2423_v10, %v1741_v13 }
 0x83b   :  { %v2425_v23 = vpop.eup %2424 }
 0x83c   :  { %v1745_v19 = vadd.f32 %v1744_v55, %v1743_v18 }
 0x83e   :  { %2426 = vtanh.f32 %v1745_v19  ;;  %1751 = vst [vmem:[#allocation4 - $0x6] sm:$0xc0] %v1745_v19 }
 0x848   :  { %v2427_v27 = vpop.eup %2426 }
 0x849   :  { %v1747_v28 = vmul.f32 %v2427_v27, %v2425_v23 }
 0x84b   :  { %1780 = vst [vmem:[%s3090_s4 - $0x4] sm:$0xc0] %v1747_v28  ;;  %1750 = vst [vmem:[#allocation3 - $0x6] sm:$0xc0] %v1747_v28 }

</bundles_post_ra>
